<compile_context>
chip_gen: v6e
topology: v6e:2x2x1
jax: 0.10.0
libtpu: 0.0.40
codegen_flags: <defaults>
</compile_context>

<pallas_src>
import functools

import jax
import jax.numpy as jnp
from jax.experimental import pallas as pl
from jax.experimental.pallas import tpu as pltpu

_MASK_FILL = -1e30  # large-negative logit for non-edges (representable in bf16)


# ---------------------------------------------------------------------------
# Kernels
# ---------------------------------------------------------------------------
def _proj_kernel(x_ref, w_ref, att_ref, xh_ref, logit_ref):
    """Fused-head projection + fused attention logits for one row tile.

    x_ref   : [TM, F_in]  bf16
    w_ref   : [F_in, H*C] bf16 (resident)
    att_ref : [H*C, 2H]   bf16 (resident, block-diag [att_dst | att_src])
    xh_ref  : [TM, H*C]   bf16 out
    logit_ref: [TM, 2H]   bf16 out  (cols [:H] = a_dst, [H:] = a_src)
    """
    xh = jnp.dot(x_ref[...], w_ref[...], preferred_element_type=jnp.float32)
    xh_b = xh.astype(jnp.bfloat16)
    xh_ref[...] = xh_b
    # Single tiny MXU dot for both logit families, fed with the bf16 copy.
    logit_ref[...] = jnp.dot(xh_b, att_ref[...],
                             preferred_element_type=jnp.float32
                             ).astype(jnp.bfloat16)


def _attn_kernel(xh_ref, a_dst_ref, a_src_t_ref, adj_ref, bias_ref, out_ref,
                 *, heads, c, apply_elu, stripe_dtype):
    """Masked multi-head attention + mean-over-heads for one destination tile.

    xh_ref     : [N_pad, H*C] bf16 (resident)
    a_dst_ref  : [TM, H]      bf16 (row tile)
    a_src_t_ref: [H, N_pad]   bf16 (resident)
    adj_ref    : [TM, N_pad]  int8 {0,1} (streamed stripe)
    bias_ref   : [1, C]       f32  (resident)
    out_ref    : [TM, C]      f32 or bf16
    """
    a_dst = a_dst_ref[...].astype(stripe_dtype)      # [TM, H]
    a_src = a_src_t_ref[...].astype(stripe_dtype)    # [H, N_pad]
    adj = adj_ref[...]                                # [TM, N_pad] int8
    neg = jnp.asarray(_MASK_FILL, dtype=stripe_dtype)

    acc = None
    # Static unroll over heads (heads=4); slices below are static so they stay
    # cheap lane slices.  TODO(synk): switch to lax.fori_loop(unroll=True) if a
    # bundle dump ever shows vreg spills from the four live [TM, N] stripes.
    for h in range(heads):
        z = a_dst[:, h:h + 1] + a_src[h:h + 1, :]                 # [TM, N]
        e = jnp.maximum(z, z * 0.2)                               # leakyrelu(0.2)
        e = jnp.where(adj != 0, e, neg)                           # mask non-edges
        e = e - jnp.max(e, axis=-1, keepdims=True)                # safe softmax
        p = jnp.exp(e)                                            # <= 1, masked -> 0
        s = jnp.sum(p, axis=-1, keepdims=True, dtype=jnp.float32)  # [TM, 1] f32
        p_mm = p if p.dtype == jnp.bfloat16 else p.astype(jnp.bfloat16)
        xh_h = xh_ref[:, h * c:(h + 1) * c]                       # [N_pad, C] bf16
        ho = jnp.dot(p_mm, xh_h, preferred_element_type=jnp.float32)  # [TM, C]
        ho = ho * pl.reciprocal(s, approx=True)                   # normalize after agg
        acc = ho if acc is None else acc + ho

    out = acc * jnp.float32(1.0 / heads) + bias_ref[...]          # mean heads + bias
    if apply_elu:                                                 # F.elu, alpha = 1
        out = jnp.where(out > 0, out, jnp.exp(jnp.minimum(out, 0.0)) - 1.0)
    out_ref[...] = out.astype(out_ref.dtype)


# ---------------------------------------------------------------------------
# Layer wrapper
# ---------------------------------------------------------------------------
@functools.partial(jax.jit, static_argnames=(
    "heads", "apply_elu", "tm", "bf16_stripe", "bf16_out", "single_buf",
    "vmem_limit"))
def _gat_layer(x_pad, w_all, att_all, bias, adj, *, heads, apply_elu, tm,
               bf16_stripe, bf16_out, single_buf, vmem_limit):
    n_pad, f_in = x_pad.shape
    hc = w_all.shape[1]
    c = hc // heads
    grid = (n_pad // tm,)

    def resident(block_shape, index_map):
        # Constant-index inputs: request a single VMEM buffer (no double
        # buffering) -- important for fitting TM=256 stripes in v7x's 64 MiB.
        if single_buf:
            return pl.BlockSpec(block_shape, index_map,
                                pipeline_mode=pl.Buffered(1))
        return pl.BlockSpec(block_shape, index_map)

    # --- projection pass (tiled over rows, no cross-step state) -------------
    xh, logits = pl.pallas_call(
        _proj_kernel,
        out_shape=(
            jax.ShapeDtypeStruct((n_pad, hc), jnp.bfloat16),
            jax.ShapeDtypeStruct((n_pad, 2 * heads), jnp.bfloat16),
        ),
        grid=grid,
        in_specs=[
            pl.BlockSpec((tm, f_in), lambda i: (i, 0)),
            resident((f_in, hc), lambda i: (0, 0)),          # W_all resident
            resident((hc, 2 * heads), lambda i: (0, 0)),     # att blocks resident
        ],
        out_specs=(
            pl.BlockSpec((tm, hc), lambda i: (i, 0)),
            pl.BlockSpec((tm, 2 * heads), lambda i: (i, 0)),
        ),
        compiler_params=pltpu.CompilerParams(
            dimension_semantics=("parallel",),
            vmem_limit_bytes=vmem_limit,
        ),
        cost_estimate=pl.CostEstimate(
            flops=2 * n_pad * f_in * hc + 4 * n_pad * hc * heads,
            transcendentals=0,
            bytes_accessed=2 * n_pad * f_in + 2 * f_in * hc
                           + 2 * n_pad * hc + 4 * n_pad * heads,
        ),
    )(x_pad, w_all, att_all)

    a_dst = logits[:, :heads]          # [N_pad, H] bf16
    a_src_t = logits[:, heads:].T      # [H, N_pad] bf16 (tiny glue transpose,
                                       #  4*N elems << the N^2 adjacency stream)

    # --- attention pass (row-tiled, int8 adjacency streamed as stripes) -----
    stripe_dtype = jnp.bfloat16 if bf16_stripe else jnp.float32
    out_dtype = jnp.bfloat16 if bf16_out else jnp.float32
    attn = functools.partial(_attn_kernel, heads=heads, c=c,
                             apply_elu=apply_elu, stripe_dtype=stripe_dtype)
    # TODO(synk): on v5e, consider pipeline_mode=pl.Buffered(3) on the adjacency
    #             stripe if the DMA ever shows up exposed at very large N.
    out = pl.pallas_call(
        attn,
        out_shape=jax.ShapeDtypeStruct((n_pad, c), out_dtype),
        grid=grid,
        in_specs=[
            resident((n_pad, hc), lambda i: (0, 0)),         # xh_all resident
            pl.BlockSpec((tm, heads), lambda i: (i, 0)),     # a_dst row tile
            resident((heads, n_pad), lambda i: (0, 0)),      # a_src^T resident
            pl.BlockSpec((tm, n_pad), lambda i: (i, 0)),     # int8 adjacency stripe
            resident((1, c), lambda i: (0, 0)),              # bias resident
        ],
        out_specs=pl.BlockSpec((tm, c), lambda i: (i, 0)),
        compiler_params=pltpu.CompilerParams(
            dimension_semantics=("parallel",),               # megacore on v7x
            vmem_limit_bytes=vmem_limit,
        ),
        cost_estimate=pl.CostEstimate(
            flops=heads * (2 * n_pad * n_pad * c + 6 * n_pad * n_pad),
            transcendentals=heads * n_pad * n_pad,
            bytes_accessed=n_pad * n_pad + 2 * n_pad * hc
                           + 4 * n_pad * heads + 4 * n_pad * c,
        ),
    )(xh, a_dst, a_src_t, adj, bias)
    return out


# ---------------------------------------------------------------------------
# Glue (plain JAX): parameter fusion, padding, adjacency mask, chip dispatch
# ---------------------------------------------------------------------------
def _round_up(v, m):
    return (v + m - 1) // m * m


def _choose_tile(n, row_tile):
    # Multiples of 32 keep bf16 (16) and int8 (32) sublane packing happy.
    tm = _round_up(min(row_tile, _round_up(n, 32)), 32)
    n_pad = _round_up(n, tm)
    return tm, n_pad


def _device_kind():
    try:
        return jax.devices()[0].device_kind.lower()
    except Exception:
        return ""


def _has_bf16_vpu(kind):
    # bf16 VALU/EUP is present on v6e and v7x (not v5e or older).
    return any(t in kind for t in ("v6", "v7", "7x"))


def _vmem_limit_bytes(kind):
    if any(t in kind for t in ("v5", "v6")):
        return 100 * 1024 * 1024      # 128 MiB physical VMEM
    if any(t in kind for t in ("v7", "7x")):
        return 56 * 1024 * 1024       # 64 MiB physical per TC, leave headroom
    return 48 * 1024 * 1024           # conservative default


def _default_row_tile(kind):
    return 512 if any(t in kind for t in ("v5", "v6")) else 256


def _fuse_heads(w):
    """[heads, F_in, C] -> [F_in, heads*C] (head-major column blocks)."""
    heads, f_in, c = w.shape
    return jnp.transpose(w, (1, 0, 2)).reshape(f_in, heads * c)


def _att_block(att):
    """[heads, 1, C] -> block-diagonal [heads*C, heads]."""
    heads, _, c = att.shape
    a = att.reshape(heads, c)
    blk = jnp.zeros((heads * c, heads), jnp.float32)
    for h in range(heads):
        blk = blk.at[h * c:(h + 1) * c, h].set(a[h])
    return blk


def _adjacency_i8(edge_index, n_pad):
    """int8 adjacency [n_pad, n_pad]: 1 for edges / self-loops, 0 otherwise."""
    adj = jnp.zeros((n_pad, n_pad), jnp.int8)
    adj = adj.at[edge_index[1], edge_index[0]].set(1)     # adj[dst, src]
    idx = jnp.arange(n_pad)
    adj = adj.at[idx, idx].set(1)                         # self-loops (also pads)
    return adj


def gat_forward(x, edge_index, params, *, heads=4, row_tile=None):
    """x = elu(conv1(x, edge_index)); x = conv2(x, edge_index)"""
    n, _ = x.shape
    kind = _device_kind()
    if row_tile is None:
        row_tile = _default_row_tile(kind)
    tm, n_pad = _choose_tile(n, row_tile)
    bf16_stripe = _has_bf16_vpu(kind)
    vmem_limit = _vmem_limit_bytes(kind)

    # bf16 operands for the MXU path; bias stays f32.
    x_pad = jnp.zeros((n_pad, x.shape[1]), jnp.bfloat16).at[:n].set(
        x.astype(jnp.bfloat16))
    adj = _adjacency_i8(edge_index, n_pad)

    w1 = _fuse_heads(params["w1"]).astype(jnp.bfloat16)
    w2 = _fuse_heads(params["w2"]).astype(jnp.bfloat16)
    att1 = jnp.concatenate(
        [_att_block(params["att_dst1"]), _att_block(params["att_src1"])],
        axis=1).astype(jnp.bfloat16)
    att2 = jnp.concatenate(
        [_att_block(params["att_dst2"]), _att_block(params["att_src2"])],
        axis=1).astype(jnp.bfloat16)

    def run(single_buf):
        h = _gat_layer(x_pad, w1, att1, params["b1"], adj,
                       heads=heads, apply_elu=True, tm=tm,
                       bf16_stripe=bf16_stripe, bf16_out=True,
                       single_buf=single_buf, vmem_limit=vmem_limit)
        out = _gat_layer(h, w2, att2, params["b2"], adj,
                         heads=heads, apply_elu=False, tm=tm,
                         bf16_stripe=bf16_stripe, bf16_out=False,
                         single_buf=single_buf, vmem_limit=vmem_limit)
        return out[:n]

    try:
        return run(True)
    except Exception:
        # This JAX build does not support pipeline_mode=pl.Buffered(1) on a
        # top-level pallas_call; fall back to default double-buffering.
        return run(False)


def glorot(key, shape):
    fan_in, fan_out = shape[-2], shape[-1]
    limit = (6.0 / (fan_in + fan_out)) ** 0.5
    return jax.random.uniform(key, shape, jnp.float32, -limit, limit)


# TODO(synk): source-dimension (column) tiling with online softmax for graphs
#             where a single [TM, N] stripe no longer fits VMEM (N >> 32k).

if __name__ == "__main__":
    key = jax.random.PRNGKey(0)
    ks = jax.random.split(key, 12)

    # Small, forward-consistent shapes (row_tile=32 -> padded N=64, grid of 2).
    N, E = 40, 120
    in_feats, h_feats, out_feats, heads = 8, 32, 8, 4

    x = jax.random.normal(ks[0], (N, in_feats), jnp.float32)
    src = jax.random.randint(ks[1], (E,), 0, N)
    dst = jax.random.randint(ks[2], (E,), 0, N)
    edge_index = jnp.stack([src, dst], axis=0)               # [2, E]

    # PyG GATConv(in, out, heads=4, concat=False)-shaped synthetic parameters.
    params = {
        "w1":       glorot(ks[3], (heads, in_feats, h_feats)),
        "att_src1": glorot(ks[4], (heads, 1, h_feats)),
        "att_dst1": glorot(ks[5], (heads, 1, h_feats)),
        "b1":       jnp.zeros((1, h_feats), jnp.float32),
        "w2":       glorot(ks[6], (heads, h_feats, out_feats)),
        "att_src2": glorot(ks[7], (heads, 1, out_feats)),
        "att_dst2": glorot(ks[8], (heads, 1, out_feats)),
        "b2":       jnp.zeros((1, out_feats), jnp.float32),
    }

    out = gat_forward(x, edge_index, params, heads=heads, row_tile=32)
    jax.block_until_ready(out)
    assert out.shape == (N, out_feats) and out.dtype == jnp.float32
    assert bool(jnp.all(jnp.isfinite(out)))
    print("KERNEL_OK")
</pallas_src>

<mosaic_0001>
module attributes {stable_mosaic.version = 11 : i64} {
  func.func @_proj_kernel(%arg0: i32, %arg1: memref<32x8xbf16, #tpu.memory_space<vmem>>, %arg2: memref<8x128xbf16, #tpu.memory_space<vmem>>, %arg3: memref<128x8xbf16, #tpu.memory_space<vmem>>, %arg4: memref<32x128xbf16, #tpu.memory_space<vmem>>, %arg5: memref<32x8xbf16, #tpu.memory_space<vmem>>) attributes {dimension_semantics = [#tpu.dimension_semantics<parallel>], iteration_bounds = array<i64: 2>, scalar_prefetch = 0 : i64, scratch_operands = 0 : i64, tpu.core_type = #tpu.core_type<tc>, window_params = [{transform_indices = @transform_0, window_bounds = array<i64: 32, 8>}, {pipeline_mode = #tpu.pipeline_mode<synchronous>, transform_indices = @transform_1, window_bounds = array<i64: 8, 128>}, {pipeline_mode = #tpu.pipeline_mode<synchronous>, transform_indices = @transform_2, window_bounds = array<i64: 128, 8>}, {transform_indices = @transform_3, window_bounds = array<i64: 32, 128>}, {transform_indices = @transform_4, window_bounds = array<i64: 32, 8>}]} {
    %c0 = arith.constant 0 : index
    %c0_0 = arith.constant 0 : index
    %0 = vector.load %arg1[%c0, %c0_0] : memref<32x8xbf16, #tpu.memory_space<vmem>>, vector<32x8xbf16>
    %c0_1 = arith.constant 0 : index
    %c0_2 = arith.constant 0 : index
    %1 = vector.load %arg2[%c0_1, %c0_2] : memref<8x128xbf16, #tpu.memory_space<vmem>>, vector<8x128xbf16>
    %cst = arith.constant dense<0.000000e+00> : vector<32x128xf32>
    %2 = tpu.matmul %0, %1, %cst {dimension_numbers = #tpu.dot_dimension_numbers<[1], [0], [0], [1], [0, 0, 1, 1], [], []>} : vector<32x8xbf16>, vector<8x128xbf16>, vector<32x128xf32> -> vector<32x128xf32>
    %3 = arith.truncf %2 : vector<32x128xf32> to vector<32x128xbf16>
    %c0_3 = arith.constant 0 : index
    %c0_4 = arith.constant 0 : index
    %4 = vector.load %arg4[%c0_3, %c0_4] : memref<32x128xbf16, #tpu.memory_space<vmem>>, vector<32x128xbf16>
    tpu.vector_store %arg4[%c0_3, %c0_4], %3 {strides = array<i32>} : memref<32x128xbf16, #tpu.memory_space<vmem>>, vector<32x128xbf16>,
    %c0_5 = arith.constant 0 : index
    %c0_6 = arith.constant 0 : index
    %5 = vector.load %arg3[%c0_5, %c0_6] : memref<128x8xbf16, #tpu.memory_space<vmem>>, vector<128x8xbf16>
    %cst_7 = arith.constant dense<0.000000e+00> : vector<32x8xf32>
    %6 = tpu.matmul %3, %5, %cst_7 {dimension_numbers = #tpu.dot_dimension_numbers<[1], [0], [0], [1], [0, 0, 1, 1], [], []>} : vector<32x128xbf16>, vector<128x8xbf16>, vector<32x8xf32> -> vector<32x8xf32>
    %7 = arith.truncf %6 : vector<32x8xf32> to vector<32x8xbf16>
    %c0_8 = arith.constant 0 : index
    %c0_9 = arith.constant 0 : index
    %8 = vector.load %arg5[%c0_8, %c0_9] : memref<32x8xbf16, #tpu.memory_space<vmem>>, vector<32x8xbf16>
    tpu.vector_store %arg5[%c0_8, %c0_9], %7 {strides = array<i32>} : memref<32x8xbf16, #tpu.memory_space<vmem>>, vector<32x8xbf16>,
    return
  }
  func.func @transform_0(%arg0: i32) -> (i32, i32) {
    %c0_i32 = arith.constant 0 : i32
    %c0_i32_0 = arith.constant 0 : i32
    return %arg0, %c0_i32 : i32, i32
  }
  func.func @transform_1(%arg0: i32) -> (i32, i32) {
    %c0_i32 = arith.constant 0 : i32
    %c0_i32_0 = arith.constant 0 : i32
    %c0_i32_1 = arith.constant 0 : i32
    return %c0_i32, %c0_i32_0 : i32, i32
  }
  func.func @transform_2(%arg0: i32) -> (i32, i32) {
    %c0_i32 = arith.constant 0 : i32
    %c0_i32_0 = arith.constant 0 : i32
    %c0_i32_1 = arith.constant 0 : i32
    return %c0_i32, %c0_i32_0 : i32, i32
  }
  func.func @transform_3(%arg0: i32) -> (i32, i32) {
    %c0_i32 = arith.constant 0 : i32
    %c0_i32_0 = arith.constant 0 : i32
    return %arg0, %c0_i32 : i32, i32
  }
  func.func @transform_4(%arg0: i32) -> (i32, i32) {
    %c0_i32 = arith.constant 0 : i32
    %c0_i32_0 = arith.constant 0 : i32
    return %arg0, %c0_i32 : i32, i32
  }
}

module attributes {stable_mosaic.version = 11 : i64} {
  func.func @_attn_kernel(%arg0: i32, %arg1: memref<64x128xbf16, #tpu.memory_space<vmem>>, %arg2: memref<32x4xbf16, #tpu.memory_space<vmem>>, %arg3: memref<4x64xbf16, #tpu.memory_space<vmem>>, %arg4: memref<32x64xi8, #tpu.memory_space<vmem>>, %arg5: memref<1x32xf32, #tpu.memory_space<vmem>>, %arg6: memref<32x32xbf16, #tpu.memory_space<vmem>>) attributes {dimension_semantics = [#tpu.dimension_semantics<parallel>], iteration_bounds = array<i64: 2>, scalar_prefetch = 0 : i64, scratch_operands = 0 : i64, tpu.core_type = #tpu.core_type<tc>, window_params = [{pipeline_mode = #tpu.pipeline_mode<synchronous>, transform_indices = @transform_0, window_bounds = array<i64: 64, 128>}, {transform_indices = @transform_1, window_bounds = array<i64: 32, 4>}, {pipeline_mode = #tpu.pipeline_mode<synchronous>, transform_indices = @transform_2, window_bounds = array<i64: 4, 64>}, {transform_indices = @transform_3, window_bounds = array<i64: 32, 64>}, {pipeline_mode = #tpu.pipeline_mode<synchronous>, transform_indices = @transform_4, window_bounds = array<i64: 1, 32>}, {transform_indices = @transform_5, window_bounds = array<i64: 32, 32>}]} {
    %c0 = arith.constant 0 : index
    %c0_0 = arith.constant 0 : index
    %0 = vector.load %arg2[%c0, %c0_0] : memref<32x4xbf16, #tpu.memory_space<vmem>>, vector<32x4xbf16>
    %1 = arith.extf %0 : vector<32x4xbf16> to vector<32x4xf32>
    %c0_1 = arith.constant 0 : index
    %c0_2 = arith.constant 0 : index
    %2 = vector.load %arg3[%c0_1, %c0_2] : memref<4x64xbf16, #tpu.memory_space<vmem>>, vector<4x64xbf16>
    %3 = arith.extf %2 : vector<4x64xbf16> to vector<4x64xf32>
    %c0_3 = arith.constant 0 : index
    %c0_4 = arith.constant 0 : index
    %4 = vector.load %arg4[%c0_3, %c0_4] : memref<32x64xi8, #tpu.memory_space<vmem>>, vector<32x64xi8>
    %5 = vector.extract_strided_slice %1 {offsets = [0, 0], sizes = [32, 1], strides = [1, 1]} : vector<32x4xf32> to vector<32x1xf32>
    %6 = vector.extract_strided_slice %3 {offsets = [0, 0], sizes = [1, 64], strides = [1, 1]} : vector<4x64xf32> to vector<1x64xf32>
    %7 = vector.broadcast %5 : vector<32x1xf32> to vector<32x64xf32>
    %8 = vector.broadcast %6 : vector<1x64xf32> to vector<32x64xf32>
    %9 = arith.addf %7, %8 : vector<32x64xf32>
    %cst = arith.constant 2.000000e-01 : f32
    %10 = vector.broadcast %cst : f32 to vector<32x64xf32>
    %11 = arith.mulf %9, %10 : vector<32x64xf32>
    %12 = arith.maximumf %9, %11 : vector<32x64xf32>
    %c0_i8 = arith.constant 0 : i8
    %13 = vector.broadcast %c0_i8 : i8 to vector<32x64xi8>
    %14 = arith.cmpi ne, %4, %13 : vector<32x64xi8>
    %cst_5 = arith.constant -1.000000e+30 : f32
    %15 = vector.broadcast %cst_5 : f32 to vector<32x64xf32>
    %16 = arith.select %14, %12, %15 : vector<32x64xi1>, vector<32x64xf32>
    %cst_6 = arith.constant dense<0xFF800000> : vector<32xf32>
    %17 = vector.multi_reduction <maximumf>, %16, %cst_6 [1] : vector<32x64xf32> to vector<32xf32>
    %18 = vector.shape_cast %17 : vector<32xf32> to vector<32x1xf32>
    %19 = vector.broadcast %18 : vector<32x1xf32> to vector<32x64xf32>
    %20 = arith.subf %16, %19 : vector<32x64xf32>
    %21 = math.exp %20 : vector<32x64xf32>
    %cst_7 = arith.constant dense<0.000000e+00> : vector<32xf32>
    %22 = vector.multi_reduction <add>, %21, %cst_7 [1] : vector<32x64xf32> to vector<32xf32>
    %23 = vector.shape_cast %22 : vector<32xf32> to vector<32x1xf32>
    %24 = arith.truncf %21 : vector<32x64xf32> to vector<32x64xbf16>
    %c0_8 = arith.constant 0 : index
    %c0_9 = arith.constant 0 : index
    %25 = vector.load %arg1[%c0_8, %c0_9] : memref<64x128xbf16, #tpu.memory_space<vmem>>, vector<64x32xbf16>
    %cst_10 = arith.constant dense<0.000000e+00> : vector<32x32xf32>
    %26 = tpu.matmul %24, %25, %cst_10 {dimension_numbers = #tpu.dot_dimension_numbers<[1], [0], [0], [1], [0, 0, 1, 1], [], []>} : vector<32x64xbf16>, vector<64x32xbf16>, vector<32x32xf32> -> vector<32x32xf32>
    %27 = tpu.reciprocal %23 {approx = true} : vector<32x1xf32> -> vector<32x1xf32>
    %28 = vector.broadcast %27 : vector<32x1xf32> to vector<32x32xf32>
    %29 = arith.mulf %26, %28 : vector<32x32xf32>
    %30 = vector.extract_strided_slice %1 {offsets = [0, 1], sizes = [32, 1], strides = [1, 1]} : vector<32x4xf32> to vector<32x1xf32>
    %31 = vector.extract_strided_slice %3 {offsets = [1, 0], sizes = [1, 64], strides = [1, 1]} : vector<4x64xf32> to vector<1x64xf32>
    %32 = vector.broadcast %30 : vector<32x1xf32> to vector<32x64xf32>
    %33 = vector.broadcast %31 : vector<1x64xf32> to vector<32x64xf32>
    %34 = arith.addf %32, %33 : vector<32x64xf32>
    %cst_11 = arith.constant 2.000000e-01 : f32
    %35 = vector.broadcast %cst_11 : f32 to vector<32x64xf32>
    %36 = arith.mulf %34, %35 : vector<32x64xf32>
    %37 = arith.maximumf %34, %36 : vector<32x64xf32>
    %c0_i8_12 = arith.constant 0 : i8
    %38 = vector.broadcast %c0_i8_12 : i8 to vector<32x64xi8>
    %39 = arith.cmpi ne, %4, %38 : vector<32x64xi8>
    %cst_13 = arith.constant -1.000000e+30 : f32
    %40 = vector.broadcast %cst_13 : f32 to vector<32x64xf32>
    %41 = arith.select %39, %37, %40 : vector<32x64xi1>, vector<32x64xf32>
    %cst_14 = arith.constant dense<0xFF800000> : vector<32xf32>
    %42 = vector.multi_reduction <maximumf>, %41, %cst_14 [1] : vector<32x64xf32> to vector<32xf32>
    %43 = vector.shape_cast %42 : vector<32xf32> to vector<32x1xf32>
    %44 = vector.broadcast %43 : vector<32x1xf32> to vector<32x64xf32>
    %45 = arith.subf %41, %44 : vector<32x64xf32>
    %46 = math.exp %45 : vector<32x64xf32>
    %cst_15 = arith.constant dense<0.000000e+00> : vector<32xf32>
    %47 = vector.multi_reduction <add>, %46, %cst_15 [1] : vector<32x64xf32> to vector<32xf32>
    %48 = vector.shape_cast %47 : vector<32xf32> to vector<32x1xf32>
    %49 = arith.truncf %46 : vector<32x64xf32> to vector<32x64xbf16>
    %c0_16 = arith.constant 0 : index
    %c32 = arith.constant 32 : index
    %50 = vector.load %arg1[%c0_16, %c32] : memref<64x128xbf16, #tpu.memory_space<vmem>>, vector<64x32xbf16>
    %cst_17 = arith.constant dense<0.000000e+00> : vector<32x32xf32>
    %51 = tpu.matmul %49, %50, %cst_17 {dimension_numbers = #tpu.dot_dimension_numbers<[1], [0], [0], [1], [0, 0, 1, 1], [], []>} : vector<32x64xbf16>, vector<64x32xbf16>, vector<32x32xf32> -> vector<32x32xf32>
    %52 = tpu.reciprocal %48 {approx = true} : vector<32x1xf32> -> vector<32x1xf32>
    %53 = vector.broadcast %52 : vector<32x1xf32> to vector<32x32xf32>
    %54 = arith.mulf %51, %53 : vector<32x32xf32>
    %55 = arith.addf %29, %54 : vector<32x32xf32>
    %56 = vector.extract_strided_slice %1 {offsets = [0, 2], sizes = [32, 1], strides = [1, 1]} : vector<32x4xf32> to vector<32x1xf32>
    %57 = vector.extract_strided_slice %3 {offsets = [2, 0], sizes = [1, 64], strides = [1, 1]} : vector<4x64xf32> to vector<1x64xf32>
    %58 = vector.broadcast %56 : vector<32x1xf32> to vector<32x64xf32>
    %59 = vector.broadcast %57 : vector<1x64xf32> to vector<32x64xf32>
    %60 = arith.addf %58, %59 : vector<32x64xf32>
    %cst_18 = arith.constant 2.000000e-01 : f32
    %61 = vector.broadcast %cst_18 : f32 to vector<32x64xf32>
    %62 = arith.mulf %60, %61 : vector<32x64xf32>
    %63 = arith.maximumf %60, %62 : vector<32x64xf32>
    %c0_i8_19 = arith.constant 0 : i8
    %64 = vector.broadcast %c0_i8_19 : i8 to vector<32x64xi8>
    %65 = arith.cmpi ne, %4, %64 : vector<32x64xi8>
    %cst_20 = arith.constant -1.000000e+30 : f32
    %66 = vector.broadcast %cst_20 : f32 to vector<32x64xf32>
    %67 = arith.select %65, %63, %66 : vector<32x64xi1>, vector<32x64xf32>
    %cst_21 = arith.constant dense<0xFF800000> : vector<32xf32>
    %68 = vector.multi_reduction <maximumf>, %67, %cst_21 [1] : vector<32x64xf32> to vector<32xf32>
    %69 = vector.shape_cast %68 : vector<32xf32> to vector<32x1xf32>
    %70 = vector.broadcast %69 : vector<32x1xf32> to vector<32x64xf32>
    %71 = arith.subf %67, %70 : vector<32x64xf32>
    %72 = math.exp %71 : vector<32x64xf32>
    %cst_22 = arith.constant dense<0.000000e+00> : vector<32xf32>
    %73 = vector.multi_reduction <add>, %72, %cst_22 [1] : vector<32x64xf32> to vector<32xf32>
    %74 = vector.shape_cast %73 : vector<32xf32> to vector<32x1xf32>
    %75 = arith.truncf %72 : vector<32x64xf32> to vector<32x64xbf16>
    %c0_23 = arith.constant 0 : index
    %c64 = arith.constant 64 : index
    %76 = vector.load %arg1[%c0_23, %c64] : memref<64x128xbf16, #tpu.memory_space<vmem>>, vector<64x32xbf16>
    %cst_24 = arith.constant dense<0.000000e+00> : vector<32x32xf32>
    %77 = tpu.matmul %75, %76, %cst_24 {dimension_numbers = #tpu.dot_dimension_numbers<[1], [0], [0], [1], [0, 0, 1, 1], [], []>} : vector<32x64xbf16>, vector<64x32xbf16>, vector<32x32xf32> -> vector<32x32xf32>
    %78 = tpu.reciprocal %74 {approx = true} : vector<32x1xf32> -> vector<32x1xf32>
    %79 = vector.broadcast %78 : vector<32x1xf32> to vector<32x32xf32>
    %80 = arith.mulf %77, %79 : vector<32x32xf32>
    %81 = arith.addf %55, %80 : vector<32x32xf32>
    %82 = vector.extract_strided_slice %1 {offsets = [0, 3], sizes = [32, 1], strides = [1, 1]} : vector<32x4xf32> to vector<32x1xf32>
    %83 = vector.extract_strided_slice %3 {offsets = [3, 0], sizes = [1, 64], strides = [1, 1]} : vector<4x64xf32> to vector<1x64xf32>
    %84 = vector.broadcast %82 : vector<32x1xf32> to vector<32x64xf32>
    %85 = vector.broadcast %83 : vector<1x64xf32> to vector<32x64xf32>
    %86 = arith.addf %84, %85 : vector<32x64xf32>
    %cst_25 = arith.constant 2.000000e-01 : f32
    %87 = vector.broadcast %cst_25 : f32 to vector<32x64xf32>
    %88 = arith.mulf %86, %87 : vector<32x64xf32>
    %89 = arith.maximumf %86, %88 : vector<32x64xf32>
    %c0_i8_26 = arith.constant 0 : i8
    %90 = vector.broadcast %c0_i8_26 : i8 to vector<32x64xi8>
    %91 = arith.cmpi ne, %4, %90 : vector<32x64xi8>
    %cst_27 = arith.constant -1.000000e+30 : f32
    %92 = vector.broadcast %cst_27 : f32 to vector<32x64xf32>
    %93 = arith.select %91, %89, %92 : vector<32x64xi1>, vector<32x64xf32>
    %cst_28 = arith.constant dense<0xFF800000> : vector<32xf32>
    %94 = vector.multi_reduction <maximumf>, %93, %cst_28 [1] : vector<32x64xf32> to vector<32xf32>
    %95 = vector.shape_cast %94 : vector<32xf32> to vector<32x1xf32>
    %96 = vector.broadcast %95 : vector<32x1xf32> to vector<32x64xf32>
    %97 = arith.subf %93, %96 : vector<32x64xf32>
    %98 = math.exp %97 : vector<32x64xf32>
    %cst_29 = arith.constant dense<0.000000e+00> : vector<32xf32>
    %99 = vector.multi_reduction <add>, %98, %cst_29 [1] : vector<32x64xf32> to vector<32xf32>
    %100 = vector.shape_cast %99 : vector<32xf32> to vector<32x1xf32>
    %101 = arith.truncf %98 : vector<32x64xf32> to vector<32x64xbf16>
    %c0_30 = arith.constant 0 : index
    %c96 = arith.constant 96 : index
    %102 = vector.load %arg1[%c0_30, %c96] : memref<64x128xbf16, #tpu.memory_space<vmem>>, vector<64x32xbf16>
    %cst_31 = arith.constant dense<0.000000e+00> : vector<32x32xf32>
    %103 = tpu.matmul %101, %102, %cst_31 {dimension_numbers = #tpu.dot_dimension_numbers<[1], [0], [0], [1], [0, 0, 1, 1], [], []>} : vector<32x64xbf16>, vector<64x32xbf16>, vector<32x32xf32> -> vector<32x32xf32>
    %104 = tpu.reciprocal %100 {approx = true} : vector<32x1xf32> -> vector<32x1xf32>
    %105 = vector.broadcast %104 : vector<32x1xf32> to vector<32x32xf32>
    %106 = arith.mulf %103, %105 : vector<32x32xf32>
    %107 = arith.addf %81, %106 : vector<32x32xf32>
    %cst_32 = arith.constant 2.500000e-01 : f32
    %108 = vector.broadcast %cst_32 : f32 to vector<32x32xf32>
    %109 = arith.mulf %107, %108 : vector<32x32xf32>
    %c0_33 = arith.constant 0 : index
    %c0_34 = arith.constant 0 : index
    %110 = vector.load %arg5[%c0_33, %c0_34] : memref<1x32xf32, #tpu.memory_space<vmem>>, vector<1x32xf32>
    %111 = vector.broadcast %110 : vector<1x32xf32> to vector<32x32xf32>
    %112 = arith.addf %109, %111 : vector<32x32xf32>
    %cst_35 = arith.constant 0.000000e+00 : f32
    %113 = vector.broadcast %cst_35 : f32 to vector<32x32xf32>
    %114 = arith.cmpf ogt, %112, %113 : vector<32x32xf32>
    %cst_36 = arith.constant 0.000000e+00 : f32
    %115 = vector.broadcast %cst_36 : f32 to vector<32x32xf32>
    %116 = arith.minimumf %112, %115 : vector<32x32xf32>
    %117 = math.exp %116 : vector<32x32xf32>
    %cst_37 = arith.constant 1.000000e+00 : f32
    %118 = vector.broadcast %cst_37 : f32 to vector<32x32xf32>
    %119 = arith.subf %117, %118 : vector<32x32xf32>
    %120 = arith.select %114, %112, %119 : vector<32x32xi1>, vector<32x32xf32>
    %121 = arith.truncf %120 : vector<32x32xf32> to vector<32x32xbf16>
    %c0_38 = arith.constant 0 : index
    %c0_39 = arith.constant 0 : index
    %122 = vector.load %arg6[%c0_38, %c0_39] : memref<32x32xbf16, #tpu.memory_space<vmem>>, vector<32x32xbf16>
    tpu.vector_store %arg6[%c0_38, %c0_39], %121 {strides = array<i32>} : memref<32x32xbf16, #tpu.memory_space<vmem>>, vector<32x32xbf16>,
    return
  }
  func.func @transform_0(%arg0: i32) -> (i32, i32) {
    %c0_i32 = arith.constant 0 : i32
    %c0_i32_0 = arith.constant 0 : i32
    %c0_i32_1 = arith.constant 0 : i32
    return %c0_i32, %c0_i32_0 : i32, i32
  }
  func.func @transform_1(%arg0: i32) -> (i32, i32) {
    %c0_i32 = arith.constant 0 : i32
    %c0_i32_0 = arith.constant 0 : i32
    return %arg0, %c0_i32 : i32, i32
  }
  func.func @transform_2(%arg0: i32) -> (i32, i32) {
    %c0_i32 = arith.constant 0 : i32
    %c0_i32_0 = arith.constant 0 : i32
    %c0_i32_1 = arith.constant 0 : i32
    return %c0_i32, %c0_i32_0 : i32, i32
  }
  func.func @transform_3(%arg0: i32) -> (i32, i32) {
    %c0_i32 = arith.constant 0 : i32
    %c0_i32_0 = arith.constant 0 : i32
    return %arg0, %c0_i32 : i32, i32
  }
  func.func @transform_4(%arg0: i32) -> (i32, i32) {
    %c0_i32 = arith.constant 0 : i32
    %c0_i32_0 = arith.constant 0 : i32
    %c0_i32_1 = arith.constant 0 : i32
    return %c0_i32, %c0_i32_0 : i32, i32
  }
  func.func @transform_5(%arg0: i32) -> (i32, i32) {
    %c0_i32 = arith.constant 0 : i32
    %c0_i32_0 = arith.constant 0 : i32
    return %arg0, %c0_i32 : i32, i32
  }
}

module attributes {stable_mosaic.version = 11 : i64} {
  func.func @_attn_kernel(%arg0: i32, %arg1: memref<64x128xbf16, #tpu.memory_space<vmem>>, %arg2: memref<32x4xbf16, #tpu.memory_space<vmem>>, %arg3: memref<4x64xbf16, #tpu.memory_space<vmem>>, %arg4: memref<32x64xi8, #tpu.memory_space<vmem>>, %arg5: memref<1x32xf32, #tpu.memory_space<vmem>>, %arg6: memref<32x32xbf16, #tpu.memory_space<vmem>>) attributes {dimension_semantics = [#tpu.dimension_semantics<parallel>], iteration_bounds = array<i64: 2>, scalar_prefetch = 0 : i64, scratch_operands = 0 : i64, tpu.core_type = #tpu.core_type<tc>, window_params = [{pipeline_mode = #tpu.pipeline_mode<synchronous>, transform_indices = @transform_0, window_bounds = array<i64: 64, 128>}, {transform_indices = @transform_1, window_bounds = array<i64: 32, 4>}, {pipeline_mode = #tpu.pipeline_mode<synchronous>, transform_indices = @transform_2, window_bounds = array<i64: 4, 64>}, {transform_indices = @transform_3, window_bounds = array<i64: 32, 64>}, {pipeline_mode = #tpu.pipeline_mode<synchronous>, transform_indices = @transform_4, window_bounds = array<i64: 1, 32>}, {transform_indices = @transform_5, window_bounds = array<i64: 32, 32>}]} {
    %c0 = arith.constant 0 : index
    %c0_0 = arith.constant 0 : index
    %0 = vector.load %arg2[%c0, %c0_0] : memref<32x4xbf16, #tpu.memory_space<vmem>>, vector<32x4xbf16>
    %1 = arith.extf %0 : vector<32x4xbf16> to vector<32x4xf32>
    %c0_1 = arith.constant 0 : index
    %c0_2 = arith.constant 0 : index
    %2 = vector.load %arg3[%c0_1, %c0_2] : memref<4x64xbf16, #tpu.memory_space<vmem>>, vector<4x64xbf16>
    %3 = arith.extf %2 : vector<4x64xbf16> to vector<4x64xf32>
    %c0_3 = arith.constant 0 : index
    %c0_4 = arith.constant 0 : index
    %4 = vector.load %arg4[%c0_3, %c0_4] : memref<32x64xi8, #tpu.memory_space<vmem>>, vector<32x64xi8>
    %5 = vector.extract_strided_slice %1 {offsets = [0, 0], sizes = [32, 1], strides = [1, 1]} : vector<32x4xf32> to vector<32x1xf32>
    %6 = vector.extract_strided_slice %3 {offsets = [0, 0], sizes = [1, 64], strides = [1, 1]} : vector<4x64xf32> to vector<1x64xf32>
    %7 = vector.broadcast %5 : vector<32x1xf32> to vector<32x64xf32>
    %8 = vector.broadcast %6 : vector<1x64xf32> to vector<32x64xf32>
    %9 = arith.addf %7, %8 : vector<32x64xf32>
    %cst = arith.constant 2.000000e-01 : f32
    %10 = vector.broadcast %cst : f32 to vector<32x64xf32>
    %11 = arith.mulf %9, %10 : vector<32x64xf32>
    %12 = arith.maximumf %9, %11 : vector<32x64xf32>
    %c0_i8 = arith.constant 0 : i8
    %13 = vector.broadcast %c0_i8 : i8 to vector<32x64xi8>
    %14 = arith.cmpi ne, %4, %13 : vector<32x64xi8>
    %cst_5 = arith.constant -1.000000e+30 : f32
    %15 = vector.broadcast %cst_5 : f32 to vector<32x64xf32>
    %16 = arith.select %14, %12, %15 : vector<32x64xi1>, vector<32x64xf32>
    %cst_6 = arith.constant dense<0xFF800000> : vector<32xf32>
    %17 = vector.multi_reduction <maximumf>, %16, %cst_6 [1] : vector<32x64xf32> to vector<32xf32>
    %18 = vector.shape_cast %17 : vector<32xf32> to vector<32x1xf32>
    %19 = vector.broadcast %18 : vector<32x1xf32> to vector<32x64xf32>
    %20 = arith.subf %16, %19 : vector<32x64xf32>
    %21 = math.exp %20 : vector<32x64xf32>
    %cst_7 = arith.constant dense<0.000000e+00> : vector<32xf32>
    %22 = vector.multi_reduction <add>, %21, %cst_7 [1] : vector<32x64xf32> to vector<32xf32>
    %23 = vector.shape_cast %22 : vector<32xf32> to vector<32x1xf32>
    %24 = arith.truncf %21 : vector<32x64xf32> to vector<32x64xbf16>
    %c0_8 = arith.constant 0 : index
    %c0_9 = arith.constant 0 : index
    %25 = vector.load %arg1[%c0_8, %c0_9] : memref<64x128xbf16, #tpu.memory_space<vmem>>, vector<64x32xbf16>
    %cst_10 = arith.constant dense<0.000000e+00> : vector<32x32xf32>
    %26 = tpu.matmul %24, %25, %cst_10 {dimension_numbers = #tpu.dot_dimension_numbers<[1], [0], [0], [1], [0, 0, 1, 1], [], []>} : vector<32x64xbf16>, vector<64x32xbf16>, vector<32x32xf32> -> vector<32x32xf32>
    %27 = tpu.reciprocal %23 {approx = true} : vector<32x1xf32> -> vector<32x1xf32>
    %28 = vector.broadcast %27 : vector<32x1xf32> to vector<32x32xf32>
    %29 = arith.mulf %26, %28 : vector<32x32xf32>
    %30 = vector.extract_strided_slice %1 {offsets = [0, 1], sizes = [32, 1], strides = [1, 1]} : vector<32x4xf32> to vector<32x1xf32>
    %31 = vector.extract_strided_slice %3 {offsets = [1, 0], sizes = [1, 64], strides = [1, 1]} : vector<4x64xf32> to vector<1x64xf32>
    %32 = vector.broadcast %30 : vector<32x1xf32> to vector<32x64xf32>
    %33 = vector.broadcast %31 : vector<1x64xf32> to vector<32x64xf32>
    %34 = arith.addf %32, %33 : vector<32x64xf32>
    %cst_11 = arith.constant 2.000000e-01 : f32
    %35 = vector.broadcast %cst_11 : f32 to vector<32x64xf32>
    %36 = arith.mulf %34, %35 : vector<32x64xf32>
    %37 = arith.maximumf %34, %36 : vector<32x64xf32>
    %c0_i8_12 = arith.constant 0 : i8
    %38 = vector.broadcast %c0_i8_12 : i8 to vector<32x64xi8>
    %39 = arith.cmpi ne, %4, %38 : vector<32x64xi8>
    %cst_13 = arith.constant -1.000000e+30 : f32
    %40 = vector.broadcast %cst_13 : f32 to vector<32x64xf32>
    %41 = arith.select %39, %37, %40 : vector<32x64xi1>, vector<32x64xf32>
    %cst_14 = arith.constant dense<0xFF800000> : vector<32xf32>
    %42 = vector.multi_reduction <maximumf>, %41, %cst_14 [1] : vector<32x64xf32> to vector<32xf32>
    %43 = vector.shape_cast %42 : vector<32xf32> to vector<32x1xf32>
    %44 = vector.broadcast %43 : vector<32x1xf32> to vector<32x64xf32>
    %45 = arith.subf %41, %44 : vector<32x64xf32>
    %46 = math.exp %45 : vector<32x64xf32>
    %cst_15 = arith.constant dense<0.000000e+00> : vector<32xf32>
    %47 = vector.multi_reduction <add>, %46, %cst_15 [1] : vector<32x64xf32> to vector<32xf32>
    %48 = vector.shape_cast %47 : vector<32xf32> to vector<32x1xf32>
    %49 = arith.truncf %46 : vector<32x64xf32> to vector<32x64xbf16>
    %c0_16 = arith.constant 0 : index
    %c32 = arith.constant 32 : index
    %50 = vector.load %arg1[%c0_16, %c32] : memref<64x128xbf16, #tpu.memory_space<vmem>>, vector<64x32xbf16>
    %cst_17 = arith.constant dense<0.000000e+00> : vector<32x32xf32>
    %51 = tpu.matmul %49, %50, %cst_17 {dimension_numbers = #tpu.dot_dimension_numbers<[1], [0], [0], [1], [0, 0, 1, 1], [], []>} : vector<32x64xbf16>, vector<64x32xbf16>, vector<32x32xf32> -> vector<32x32xf32>
    %52 = tpu.reciprocal %48 {approx = true} : vector<32x1xf32> -> vector<32x1xf32>
    %53 = vector.broadcast %52 : vector<32x1xf32> to vector<32x32xf32>
    %54 = arith.mulf %51, %53 : vector<32x32xf32>
    %55 = arith.addf %29, %54 : vector<32x32xf32>
    %56 = vector.extract_strided_slice %1 {offsets = [0, 2], sizes = [32, 1], strides = [1, 1]} : vector<32x4xf32> to vector<32x1xf32>
    %57 = vector.extract_strided_slice %3 {offsets = [2, 0], sizes = [1, 64], strides = [1, 1]} : vector<4x64xf32> to vector<1x64xf32>
    %58 = vector.broadcast %56 : vector<32x1xf32> to vector<32x64xf32>
    %59 = vector.broadcast %57 : vector<1x64xf32> to vector<32x64xf32>
    %60 = arith.addf %58, %59 : vector<32x64xf32>
    %cst_18 = arith.constant 2.000000e-01 : f32
    %61 = vector.broadcast %cst_18 : f32 to vector<32x64xf32>
    %62 = arith.mulf %60, %61 : vector<32x64xf32>
    %63 = arith.maximumf %60, %62 : vector<32x64xf32>
    %c0_i8_19 = arith.constant 0 : i8
    %64 = vector.broadcast %c0_i8_19 : i8 to vector<32x64xi8>
    %65 = arith.cmpi ne, %4, %64 : vector<32x64xi8>
    %cst_20 = arith.constant -1.000000e+30 : f32
    %66 = vector.broadcast %cst_20 : f32 to vector<32x64xf32>
    %67 = arith.select %65, %63, %66 : vector<32x64xi1>, vector<32x64xf32>
    %cst_21 = arith.constant dense<0xFF800000> : vector<32xf32>
    %68 = vector.multi_reduction <maximumf>, %67, %cst_21 [1] : vector<32x64xf32> to vector<32xf32>
    %69 = vector.shape_cast %68 : vector<32xf32> to vector<32x1xf32>
    %70 = vector.broadcast %69 : vector<32x1xf32> to vector<32x64xf32>
    %71 = arith.subf %67, %70 : vector<32x64xf32>
    %72 = math.exp %71 : vector<32x64xf32>
    %cst_22 = arith.constant dense<0.000000e+00> : vector<32xf32>
    %73 = vector.multi_reduction <add>, %72, %cst_22 [1] : vector<32x64xf32> to vector<32xf32>
    %74 = vector.shape_cast %73 : vector<32xf32> to vector<32x1xf32>
    %75 = arith.truncf %72 : vector<32x64xf32> to vector<32x64xbf16>
    %c0_23 = arith.constant 0 : index
    %c64 = arith.constant 64 : index
    %76 = vector.load %arg1[%c0_23, %c64] : memref<64x128xbf16, #tpu.memory_space<vmem>>, vector<64x32xbf16>
    %cst_24 = arith.constant dense<0.000000e+00> : vector<32x32xf32>
    %77 = tpu.matmul %75, %76, %cst_24 {dimension_numbers = #tpu.dot_dimension_numbers<[1], [0], [0], [1], [0, 0, 1, 1], [], []>} : vector<32x64xbf16>, vector<64x32xbf16>, vector<32x32xf32> -> vector<32x32xf32>
    %78 = tpu.reciprocal %74 {approx = true} : vector<32x1xf32> -> vector<32x1xf32>
    %79 = vector.broadcast %78 : vector<32x1xf32> to vector<32x32xf32>
    %80 = arith.mulf %77, %79 : vector<32x32xf32>
    %81 = arith.addf %55, %80 : vector<32x32xf32>
    %82 = vector.extract_strided_slice %1 {offsets = [0, 3], sizes = [32, 1], strides = [1, 1]} : vector<32x4xf32> to vector<32x1xf32>
    %83 = vector.extract_strided_slice %3 {offsets = [3, 0], sizes = [1, 64], strides = [1, 1]} : vector<4x64xf32> to vector<1x64xf32>
    %84 = vector.broadcast %82 : vector<32x1xf32> to vector<32x64xf32>
    %85 = vector.broadcast %83 : vector<1x64xf32> to vector<32x64xf32>
    %86 = arith.addf %84, %85 : vector<32x64xf32>
    %cst_25 = arith.constant 2.000000e-01 : f32
    %87 = vector.broadcast %cst_25 : f32 to vector<32x64xf32>
    %88 = arith.mulf %86, %87 : vector<32x64xf32>
    %89 = arith.maximumf %86, %88 : vector<32x64xf32>
    %c0_i8_26 = arith.constant 0 : i8
    %90 = vector.broadcast %c0_i8_26 : i8 to vector<32x64xi8>
    %91 = arith.cmpi ne, %4, %90 : vector<32x64xi8>
    %cst_27 = arith.constant -1.000000e+30 : f32
    %92 = vector.broadcast %cst_27 : f32 to vector<32x64xf32>
    %93 = arith.select %91, %89, %92 : vector<32x64xi1>, vector<32x64xf32>
    %cst_28 = arith.constant dense<0xFF800000> : vector<32xf32>
    %94 = vector.multi_reduction <maximumf>, %93, %cst_28 [1] : vector<32x64xf32> to vector<32xf32>
    %95 = vector.shape_cast %94 : vector<32xf32> to vector<32x1xf32>
    %96 = vector.broadcast %95 : vector<32x1xf32> to vector<32x64xf32>
    %97 = arith.subf %93, %96 : vector<32x64xf32>
    %98 = math.exp %97 : vector<32x64xf32>
    %cst_29 = arith.constant dense<0.000000e+00> : vector<32xf32>
    %99 = vector.multi_reduction <add>, %98, %cst_29 [1] : vector<32x64xf32> to vector<32xf32>
    %100 = vector.shape_cast %99 : vector<32xf32> to vector<32x1xf32>
    %101 = arith.truncf %98 : vector<32x64xf32> to vector<32x64xbf16>
    %c0_30 = arith.constant 0 : index
    %c96 = arith.constant 96 : index
    %102 = vector.load %arg1[%c0_30, %c96] : memref<64x128xbf16, #tpu.memory_space<vmem>>, vector<64x32xbf16>
    %cst_31 = arith.constant dense<0.000000e+00> : vector<32x32xf32>
    %103 = tpu.matmul %101, %102, %cst_31 {dimension_numbers = #tpu.dot_dimension_numbers<[1], [0], [0], [1], [0, 0, 1, 1], [], []>} : vector<32x64xbf16>, vector<64x32xbf16>, vector<32x32xf32> -> vector<32x32xf32>
    %104 = tpu.reciprocal %100 {approx = true} : vector<32x1xf32> -> vector<32x1xf32>
    %105 = vector.broadcast %104 : vector<32x1xf32> to vector<32x32xf32>
    %106 = arith.mulf %103, %105 : vector<32x32xf32>
    %107 = arith.addf %81, %106 : vector<32x32xf32>
    %cst_32 = arith.constant 2.500000e-01 : f32
    %108 = vector.broadcast %cst_32 : f32 to vector<32x32xf32>
    %109 = arith.mulf %107, %108 : vector<32x32xf32>
    %c0_33 = arith.constant 0 : index
    %c0_34 = arith.constant 0 : index
    %110 = vector.load %arg5[%c0_33, %c0_34] : memref<1x32xf32, #tpu.memory_space<vmem>>, vector<1x32xf32>
    %111 = vector.broadcast %110 : vector<1x32xf32> to vector<32x32xf32>
    %112 = arith.addf %109, %111 : vector<32x32xf32>
    %cst_35 = arith.constant 0.000000e+00 : f32
    %113 = vector.broadcast %cst_35 : f32 to vector<32x32xf32>
    %114 = arith.cmpf ogt, %112, %113 : vector<32x32xf32>
    %cst_36 = arith.constant 0.000000e+00 : f32
    %115 = vector.broadcast %cst_36 : f32 to vector<32x32xf32>
    %116 = arith.minimumf %112, %115 : vector<32x32xf32>
    %117 = math.exp %116 : vector<32x32xf32>
    %cst_37 = arith.constant 1.000000e+00 : f32
    %118 = vector.broadcast %cst_37 : f32 to vector<32x32xf32>
    %119 = arith.subf %117, %118 : vector<32x32xf32>
    %120 = arith.select %114, %112, %119 : vector<32x32xi1>, vector<32x32xf32>
    %121 = arith.truncf %120 : vector<32x32xf32> to vector<32x32xbf16>
    %c0_38 = arith.constant 0 : index
    %c0_39 = arith.constant 0 : index
    %122 = vector.load %arg6[%c0_38, %c0_39] : memref<32x32xbf16, #tpu.memory_space<vmem>>, vector<32x32xbf16>
    tpu.vector_store %arg6[%c0_38, %c0_39], %121 {strides = array<i32>} : memref<32x32xbf16, #tpu.memory_space<vmem>>, vector<32x32xbf16>,
    return
  }
  func.func @transform_0(%arg0: i32) -> (i32, i32) {
    %c0_i32 = arith.constant 0 : i32
    %c0_i32_0 = arith.constant 0 : i32
    %c0_i32_1 = arith.constant 0 : i32
    return %c0_i32, %c0_i32_0 : i32, i32
  }
  func.func @transform_1(%arg0: i32) -> (i32, i32) {
    %c0_i32 = arith.constant 0 : i32
    %c0_i32_0 = arith.constant 0 : i32
    return %arg0, %c0_i32 : i32, i32
  }
  func.func @transform_2(%arg0: i32) -> (i32, i32) {
    %c0_i32 = arith.constant 0 : i32
    %c0_i32_0 = arith.constant 0 : i32
    %c0_i32_1 = arith.constant 0 : i32
    return %c0_i32, %c0_i32_0 : i32, i32
  }
  func.func @transform_3(%arg0: i32) -> (i32, i32) {
    %c0_i32 = arith.constant 0 : i32
    %c0_i32_0 = arith.constant 0 : i32
    return %arg0, %c0_i32 : i32, i32
  }
  func.func @transform_4(%arg0: i32) -> (i32, i32) {
    %c0_i32 = arith.constant 0 : i32
    %c0_i32_0 = arith.constant 0 : i32
    %c0_i32_1 = arith.constant 0 : i32
    return %c0_i32, %c0_i32_0 : i32, i32
  }
  func.func @transform_5(%arg0: i32) -> (i32, i32) {
    %c0_i32 = arith.constant 0 : i32
    %c0_i32_0 = arith.constant 0 : i32
    return %arg0, %c0_i32 : i32, i32
  }
}

module attributes {stable_mosaic.version = 11 : i64} {
  func.func @_proj_kernel(%arg0: i32, %arg1: memref<32x8xbf16, #tpu.memory_space<vmem>>, %arg2: memref<8x128xbf16, #tpu.memory_space<vmem>>, %arg3: memref<128x8xbf16, #tpu.memory_space<vmem>>, %arg4: memref<32x128xbf16, #tpu.memory_space<vmem>>, %arg5: memref<32x8xbf16, #tpu.memory_space<vmem>>) attributes {dimension_semantics = [#tpu.dimension_semantics<parallel>], iteration_bounds = array<i64: 2>, scalar_prefetch = 0 : i64, scratch_operands = 0 : i64, tpu.core_type = #tpu.core_type<tc>, window_params = [{transform_indices = @transform_0, window_bounds = array<i64: 32, 8>}, {pipeline_mode = #tpu.pipeline_mode<synchronous>, transform_indices = @transform_1, window_bounds = array<i64: 8, 128>}, {pipeline_mode = #tpu.pipeline_mode<synchronous>, transform_indices = @transform_2, window_bounds = array<i64: 128, 8>}, {transform_indices = @transform_3, window_bounds = array<i64: 32, 128>}, {transform_indices = @transform_4, window_bounds = array<i64: 32, 8>}]} {
    %c0 = arith.constant 0 : index
    %c0_0 = arith.constant 0 : index
    %0 = vector.load %arg1[%c0, %c0_0] : memref<32x8xbf16, #tpu.memory_space<vmem>>, vector<32x8xbf16>
    %c0_1 = arith.constant 0 : index
    %c0_2 = arith.constant 0 : index
    %1 = vector.load %arg2[%c0_1, %c0_2] : memref<8x128xbf16, #tpu.memory_space<vmem>>, vector<8x128xbf16>
    %cst = arith.constant dense<0.000000e+00> : vector<32x128xf32>
    %2 = tpu.matmul %0, %1, %cst {dimension_numbers = #tpu.dot_dimension_numbers<[1], [0], [0], [1], [0, 0, 1, 1], [], []>} : vector<32x8xbf16>, vector<8x128xbf16>, vector<32x128xf32> -> vector<32x128xf32>
    %3 = arith.truncf %2 : vector<32x128xf32> to vector<32x128xbf16>
    %c0_3 = arith.constant 0 : index
    %c0_4 = arith.constant 0 : index
    %4 = vector.load %arg4[%c0_3, %c0_4] : memref<32x128xbf16, #tpu.memory_space<vmem>>, vector<32x128xbf16>
    tpu.vector_store %arg4[%c0_3, %c0_4], %3 {strides = array<i32>} : memref<32x128xbf16, #tpu.memory_space<vmem>>, vector<32x128xbf16>,
    %c0_5 = arith.constant 0 : index
    %c0_6 = arith.constant 0 : index
    %5 = vector.load %arg3[%c0_5, %c0_6] : memref<128x8xbf16, #tpu.memory_space<vmem>>, vector<128x8xbf16>
    %cst_7 = arith.constant dense<0.000000e+00> : vector<32x8xf32>
    %6 = tpu.matmul %3, %5, %cst_7 {dimension_numbers = #tpu.dot_dimension_numbers<[1], [0], [0], [1], [0, 0, 1, 1], [], []>} : vector<32x128xbf16>, vector<128x8xbf16>, vector<32x8xf32> -> vector<32x8xf32>
    %7 = arith.truncf %6 : vector<32x8xf32> to vector<32x8xbf16>
    %c0_8 = arith.constant 0 : index
    %c0_9 = arith.constant 0 : index
    %8 = vector.load %arg5[%c0_8, %c0_9] : memref<32x8xbf16, #tpu.memory_space<vmem>>, vector<32x8xbf16>
    tpu.vector_store %arg5[%c0_8, %c0_9], %7 {strides = array<i32>} : memref<32x8xbf16, #tpu.memory_space<vmem>>, vector<32x8xbf16>,
    return
  }
  func.func @transform_0(%arg0: i32) -> (i32, i32) {
    %c0_i32 = arith.constant 0 : i32
    %c0_i32_0 = arith.constant 0 : i32
    return %arg0, %c0_i32 : i32, i32
  }
  func.func @transform_1(%arg0: i32) -> (i32, i32) {
    %c0_i32 = arith.constant 0 : i32
    %c0_i32_0 = arith.constant 0 : i32
    %c0_i32_1 = arith.constant 0 : i32
    return %c0_i32, %c0_i32_0 : i32, i32
  }
  func.func @transform_2(%arg0: i32) -> (i32, i32) {
    %c0_i32 = arith.constant 0 : i32
    %c0_i32_0 = arith.constant 0 : i32
    %c0_i32_1 = arith.constant 0 : i32
    return %c0_i32, %c0_i32_0 : i32, i32
  }
  func.func @transform_3(%arg0: i32) -> (i32, i32) {
    %c0_i32 = arith.constant 0 : i32
    %c0_i32_0 = arith.constant 0 : i32
    return %arg0, %c0_i32 : i32, i32
  }
  func.func @transform_4(%arg0: i32) -> (i32, i32) {
    %c0_i32 = arith.constant 0 : i32
    %c0_i32_0 = arith.constant 0 : i32
    return %arg0, %c0_i32 : i32, i32
  }
}

</mosaic_0001>

<bundles_post_ra>
// kernel: _gat_layer.2
= control target key start
LH: loop header
LB: loop body
LE: loop exit
PB: predicated region body
PF: predicated region fallthrough
CT: control target
= control target key end

     0   :  { %s678_s15 = smov 0   ;;  %s730_s0 = inlined_call_operand.vmem [shape: bf16[64,8], index: 0, kind: input, shape index: {}]   ;;  %s731_s1 = inlined_call_operand.vmem [shape: bf16[8,128], index: 1, kind: input, shape index: {}]   ;;  %s732_s2 = inlined_call_operand.vmem [shape: bf16[128,8], index: 2, kind: input, shape index: {}]   ;;  %s733_s3 = inlined_call_operand.vmem [shape: bf16[64,128], index: 3, kind: output, shape index: {0}]   ;;  %s734_s4 = inlined_call_operand.vmem [shape: bf16[64,8], index: 4, kind: output, shape index: {1}]  }
   0x1 LB: > { %s535_s16 = sadd.s32 4294967295, %s651_s15   ;;  %p539_p0 = scmp.ge.s32.totalorder %s651_s15, 1  ;;  %s651_s15 = sphi %s678_s15, %s15_s15  }
   0x2   : > { %p166_p1 = scmp.lt.s32.totalorder %s651_s15, 3 }
   0x4   : > { %p167_p2 = pnand %p539_p0, %p166_p1 }
   0x5   : > { %s540_s19 = sshll.u32 (!%p167_p2), %s535_s16, 2 }
   0x6   : > { %170 = sbr.rel (%p167_p2) target bundleno = 420 (0x1a4), region = 32  ;;  %p198_p3 = scmp.lt.s32.totalorder (!%p167_p2), %s540_s19, 7 }
   0xb   : > { %v220_v0 = vld [vmem:[%s731_s1] sm:$0xf]  ;;  %vm238_vm0 = vcmask 1043456   ;;  %v637_v1 = vld [vmem:[%s732_s2 + $0x38] sm:$0xff]   ;;  %v638_v3 = vld [vmem:[%s732_s2 + $0x30] sm:$0xff]   ;;  %s736_s19 = smov (!%p198_p3, %s540_s19), 7 }
   0xc   : > { %626 = vmatprep.subr.msk.bf16.mxu0 %vm238_vm0, %v220_v0  ;;  %v240_v2 = vsel %vm238_vm0, %v220_v0, 0  ;;  %606 = vmatprep.subr.bf16.mxu1 %v637_v1  ;;  %v639_v4 = vld [vmem:[%s732_s2 + $0x28] sm:$0xff]   ;;  %s698_s26 = sshll.u32 %s736_s19, 2  ;;  %vm231_vm1 = vcmask 64512   ;;  %v640_v5 = vld [vmem:[%s732_s2 + $0x20] sm:$0xff]   ;;  %v641_v8 = vld [vmem:[%s732_s2 + $0x18] sm:$0xff]  }
   0xd   : > { %601 = vmatpush3.bf16.msra.mxu0 %v240_v2  ;;  %607 = vmatpush3.bf16.msra.mxu1 %v637_v1  ;;  %s201_s29 = scalar_lea.vmem %s730_s0, %s698_s26  ;;  %v642_v9 = vld [vmem:[%s732_s2 + $0x10] sm:$0xff]   ;;  %v643_v10 = vld [vmem:[%s732_s2 + $0x8] sm:$0xff]   ;;  %v644_v11 = vld [vmem:[%s732_s2] sm:$0xff]   ;;  %s207_s17 = scalar_lea.vmem %s733_s3, %s698_s26  ;;  %vm440_vm2 = vcmask 60416  }
   0xe   : > { %608 = vmatprep.subr.bf16.mxu1 %v638_v3  ;;  %v635_v6 = vld [vmem:[%s201_s29] sm:$0xff]   ;;  %v636_v7 = vld [vmem:[%s201_s29 + $0x8] sm:$0xff]   ;;  %s213_s20 = scalar_lea.vmem %s734_s4, %s698_s26 }
   0xf   : > { %602 = vmatprep.mubr.msk.bf16.mxu0 %vm231_vm1, %v635_v6 }
  0x10   : > { %603 = vmatmul.mubr.msk.bf16.vlgmr.msra.gmra.mxu0 %vm231_vm1, %v636_v7 }
  0x11   : > { %609 = vmatpush3.bf16.msra.mxu1 %v638_v3 }
  0x12   : > { %610 = vmatprep.subr.bf16.mxu1 %v639_v4 }
  0x15   : > { %611 = vmatpush3.bf16.msra.mxu1 %v639_v4 }
  0x16   : > { %612 = vmatprep.subr.bf16.mxu1 %v640_v5 }
  0x19   : > { %613 = vmatpush3.bf16.msra.mxu1 %v640_v5 }
  0x1a   : > { %614 = vmatprep.subr.bf16.mxu1 %v641_v8 }
  0x1d   : > { %615 = vmatpush3.bf16.msra.mxu1 %v641_v8 }
  0x1e   : > { %616 = vmatprep.subr.bf16.mxu1 %v642_v9 }
  0x21   : > { %617 = vmatpush3.bf16.msra.mxu1 %v642_v9 }
  0x22   : > { %618 = vmatprep.subr.bf16.mxu1 %v643_v10 }
  0x25   : > { %619 = vmatpush3.bf16.msra.mxu1 %v643_v10 }
  0x26   : > { %620 = vmatprep.subr.bf16.mxu1 %v644_v11 }
  0x29   : > { %621 = vmatpush3.bf16.msra.mxu1 %v644_v11 }
  0xd0   : > { %v604_v12 = vpop.f32.mrf.mxu0 }
  0xd2   : > { %v276_v13 = vpop.f32.mrf.mxu0 }
  0xd4   : > { %v605_v14 = vpop.f32.mrf.mxu0 }
  0xd5   : > { %v292_v17 = vpack.c.bf16 %v605_v14, %v604_v12 }
  0xd6   : > { %v279_v15 = vpop.f32.mrf.mxu0 }
  0xd7   : > { %v291_v16 = vpack.c.bf16 %v279_v15, %v276_v13  ;;  %586 = vst [vmem:[%s207_s17 + $0x8] sm:$0xff] %v292_v17  }
  0xd9   : > { %580 = vst [vmem:[%s207_s17] sm:$0xff] %v291_v16   ;;  %622 = vmatprep.mubr.bf16.mxu1 %v291_v16 }
  0xda   : > { %623 = vmatmul.mubr.bf16.vlgmr.msra.gmra.mxu1 %v292_v17 }
 0x19a   : > { %v624_v18 = vpop.f32.mrf.mxu1 }
 0x19b   : > { %v574_v24 = vpack.c.bf16 %v624_v18, %v624_v18 }
 0x19c   : > { %v409_v19 = vpop.f32.mrf.mxu1 }
 0x19d   : > { %v572_v20 = vpack.c.bf16 %v409_v19, %v409_v19  ;;  %443 = vst.msk [vmem:[%s213_s20 + $0x8] sm:$0xf] %vm440_vm2, %v574_v24 }
 0x19e   : > { %v625_v21 = vpop.f32.mrf.mxu1 }
 0x19f   : > { %441 = vst.msk [vmem:[%s213_s20] sm:$0xf] %vm440_vm2, %v572_v20  ;;  %v575_v25 = vpack.c.bf16 %v625_v21, %v625_v21 }
 0x1a0   : > { %v412_v22 = vpop.f32.mrf.mxu1 }
 0x1a1   : > { %v573_v23 = vpack.c.bf16 %v412_v22, %v412_v22  ;;  %444 = vst.msk [vmem:[%s213_s20 + $0xc] sm:$0xf] %vm440_vm2, %v575_v25 }
 0x1a3   : > { %442 = vst.msk [vmem:[%s213_s20 + $0x4] sm:$0xf] %vm440_vm2, %v573_v23 }
 0x1a4 PF: > { %s15_s15 = sadd.s32 1, %s651_s15  }
 0x1a5   : > { %p12_p4 = scmp.ge.s32.totalorder %s15_s15, 4  }
 0x1a7   :  { %14 = sbr.rel (!%p12_p4) target bundleno = 1 (0x1), region = 74 }

// kernel: _gat_layer.3
= control target key start
LH: loop header
LB: loop body
LE: loop exit
PB: predicated region body
PF: predicated region fallthrough
CT: control target
= control target key end

     0   :  { %s1366_s18 = smov 0   ;;  %s1623_s0 = inlined_call_operand.vmem [shape: bf16[64,128], index: 0, kind: input, shape index: {}]   ;;  %s1624_s1 = inlined_call_operand.vmem [shape: bf16[64,4], index: 1, kind: input, shape index: {}]   ;;  %s1625_s2 = inlined_call_operand.vmem [shape: bf16[4,64], index: 2, kind: input, shape index: {}]   ;;  %s1626_s3 = inlined_call_operand.vmem [shape: s8[64,64], index: 3, kind: input, shape index: {}]   ;;  %s1627_s4 = inlined_call_operand.vmem [shape: f32[1,32], index: 4, kind: input, shape index: {}]   ;;  %s1628_s5 = inlined_call_operand.vmem [shape: bf16[64,32], index: 5, kind: output, shape index: {}]  }
   0x1 LB: > { %s1372_s19 = sadd.s32 4294967295, %s1327_s18   ;;  %p1054_p0 = scmp.ge.s32.totalorder %s1327_s18, 1  ;;  %s1327_s18 = sphi %s1366_s18, %s15_s18  }
   0x2   : > { %p197_p1 = scmp.lt.s32.totalorder %s1327_s18, 3 }
   0x4   : > { %p198_p2 = pnand %p1054_p0, %p197_p1 }
   0x5   : > { %s1055_s20 = sshll.u32 (!%p198_p2), %s1372_s19, 2  ;;  %s1333_s8 = smov (!%p198_p2), 96  }
   0x6   : > { %201 = sbr.rel (%p198_p2) target bundleno = 573 (0x23d), region = 40  ;;  %p230_p3 = scmp.lt.s32.totalorder (!%p198_p2), %s1055_s20, 7 }
   0x7   : > { %s1334_s9 = smov (!%p198_p2), 64   ;;  %s1335_s10 = smov (!%p198_p2), 32  }
   0x8   : > { %p235_p4 = scmp.lt.s32.totalorder (!%p198_p2), %s1372_s19, 1 }
   0xb   : > { %v1229_v0 = vld [vmem:[%s1623_s0 + $0x18] sm:$0xff]   ;;  %v1329_v1 = vmov 0   ;;  %v1330_v2 = vmov 1   ;;  %s1638_s20 = smov (!%p230_p3, %s1055_s20), 7  ;;  %v1231_v3 = vld [vmem:[%s1623_s0 + $0x10] sm:$0xff]   ;;  %v1230_v4 = vld [vmem:[%s1623_s0 + $0x8] sm:$0xff]   ;;  %v279_v25 = vlaneseq }
   0xc   : > { %1183 = vset.pattern.permute.xlu0 %v1329_v1  ;;  %1194 = vset.pattern.permute.xlu1 %v1330_v2  ;;  %s1056_s25 = sshll.u32 %s1638_s20, 2  ;;  %v1398_v12 = vld [vmem:[%s1623_s0] sm:$0xff]   ;;  %v1331_v14 = vmov 2   ;;  %v1332_v15 = vmov 3   ;;  %s1640_s19 = smov (!%p235_p4, %s1372_s19), 1  ;;  %vm329_vm6 = vcmask 523264  }
   0xd   : > { %1120 = vmatprep.subr.bf16.mxu0 %v1229_v0  ;;  %s233_s28 = scalar_lea.vmem %s1624_s1, %s1056_s25  ;;  %s1057_s11 = sshll.u32 %s1640_s19, 3  ;;  %v280_v30 = vshrl.u32 %v279_v25, 7  ;;  %v256_v31 = vld [vmem:[%s1625_s2] sm:$0x3]  ;;  %vm977_vm11 = vcmask 257024  }
   0xe   : > { %1121 = vmatpush3.bf16.msra.mxu0 %v1229_v0  ;;  %v1088_v5 = vld [vmem:[%s233_s28] sm:$0xff]   ;;  %v1095_v6 = vld [vmem:[%s233_s28 + $0x8] sm:$0xff]   ;;  %s238_s14 = scalar_lea.vmem %s1626_s3, %s1057_s11  ;;  %v257_v33 = vunpack.c.l.bf16 %v256_v31  ;;  %s243_s23 = scalar_lea.vmem %s1628_s5, %s1056_s25 }
   0xf   : > { %1122 = vmatprep.subr.bf16.mxu0 %v1231_v3  ;;  %v1089_v7 = vunpack.c.l.bf16 %v1088_v5  ;;  %v1090_v8 = vunpack.c.h.bf16 %v1088_v5  ;;  %v1093_v9 = vunpack.c.l.bf16 %v1095_v6  ;;  %v1094_v10 = vunpack.c.h.bf16 %v1095_v6  ;;  %v258_v16 = vld [vmem:[%s238_s14] sm:$0xff] }
  0x10   : > { %vm295_vm0 = vnez %v258_v16  ;;  %v281_v34 = vsub.s32 0, %v280_v30  ;;  %v481_v35 = vsub.s32 1, %v280_v30  ;;  %v634_v47 = vsub.s32 2, %v280_v30 }
  0x11   : > { %v1184_v11 = vpack.i.bf16 %v1090_v8, %v1089_v7  ;;  %v1189_v13 = vpack.i.bf16 %v1094_v10, %v1093_v9  ;;  %v296_v17 = vsel %vm295_vm0, 16843009, %v1329_v1  ;;  %v787_v52 = vsub.s32 3, %v280_v30 }
  0x12   : > { %1123 = vmatpush3.bf16.msra.mxu0 %v1231_v3  ;;  %v298_v18 = vunpack.c.1.s8 %v296_v17  ;;  %v297_v19 = vunpack.c.0.s8 %v296_v17  ;;  %v300_v20 = vunpack.c.3.s8 %v296_v17  ;;  %v299_v21 = vunpack.c.2.s8 %v296_v17 }
  0x13   : > { %1124 = vmatprep.subr.bf16.mxu0 %v1230_v4  ;;  %1185 = vperm.xlu0 %1183, %v1184_v11   ;;  %v282_v39 = vrot.slane %v257_v33, %v281_v34  ;;  %v482_v40 = vrot.slane %v257_v33, %v481_v35  ;;  %v635_v61 = vrot.slane %v257_v33, %v634_v47 }
  0x14   : > { %1196 = vperm.xlu1 %1194, %v1184_v11   ;;  %v303_v22 = vpack.c.b16 %v298_v18, %v298_v18  ;;  %v301_v23 = vpack.c.b16 %v297_v19, %v297_v19  ;;  %v307_v24 = vpack.c.b16 %v300_v20, %v300_v20  ;;  %v305_v26 = vpack.c.b16 %v299_v21, %v299_v21 }
  0x15   : > { %v1438_v2 = vrot.slane %v257_v33, %v787_v52 }
  0x16   : > { %1125 = vmatpush3.bf16.msra.mxu0 %v1230_v4  ;;  %v304_v27 = vpack.c.b8 %v303_v22, %v303_v22  ;;  %v302_v28 = vpack.c.b8 %v301_v23, %v301_v23  ;;  %v308_v29 = vpack.c.b8 %v307_v24, %v307_v24  ;;  %v306_v32 = vpack.c.b8 %v305_v26, %v305_v26 }
  0x17   : > { %1126 = vmatprep.subr.bf16.mxu0 %v1398_v12  ;;  %1190 = vperm.xlu0 %1183, %v1189_v13  }
  0x18   : > { %1201 = vperm.xlu1 %1194, %v1189_v13   ;;  %vm310_vm1 = vnez %v304_v27  ;;  %vm309_vm2 = vnez %v302_v28  ;;  %vm312_vm3 = vnez %v308_v29  ;;  %vm311_vm4 = vnez %v306_v32 }
  0x19   : > { %v314_v36 = vsel %vm310_vm1, 16843009, %v1329_v1  ;;  %v313_v37 = vsel %vm309_vm2, 16843009, %v1329_v1  ;;  %v316_v38 = vsel %vm312_vm3, 16843009, %v1329_v1 }
  0x1a   : > { %1127 = vmatpush3.bf16.msra.mxu0 %v1398_v12  ;;  %v315_v41 = vsel %vm311_vm4, 16843009, %v1329_v1  ;;  %v318_v44 = vunpack.c.0.s8 %v314_v36  ;;  %v317_v45 = vunpack.c.0.s8 %v313_v37  ;;  %v320_v46 = vunpack.c.0.s8 %v316_v38 }
  0x1b   : > { %1205 = vset.pattern.permute.xlu0 %v1331_v14  ;;  %v319_v48 = vunpack.c.0.s8 %v315_v41 }
  0x1c   : > { %1211 = vset.pattern.permute.xlu1 %v1331_v14  ;;  %1207 = vperm.xlu0 %1205, %v1184_v11   ;;  %vm1422_vm5 = vcmp.ne.s32.totalorder %v318_v44, 0  ;;  %vm1426_vm7 = vcmp.ne.s32.totalorder %v317_v45, 0  ;;  %vm1430_vm8 = vcmp.ne.s32.totalorder %v320_v46, 0 }
  0x1d   : > { %1213 = vperm.xlu1 %1211, %v1189_v13   ;;  %vm1434_vm9 = vcmp.ne.s32.totalorder %v319_v48, 0 }
  0x20   : > { %1223 = vset.pattern.permute.xlu0 %v1332_v15 }
  0x21   : > { %1217 = vset.pattern.permute.xlu1 %v1332_v15  ;;  %1225 = vperm.xlu0 %1223, %v1189_v13  }
  0x22   : > { %1219 = vperm.xlu1 %1217, %v1184_v11  }
  0x25   : > { %541 = vrot.lane.b32.xlu0 %v1231_v3, %s1333_s8 }
  0x26   : > { %543 = vrot.lane.b32.xlu1 %v1229_v0, %s1333_s8 }
  0x29   : > { %694 = vrot.lane.b32.xlu0 %v1231_v3, %s1334_s9 }
  0x2a   : > { %539 = vrot.lane.b32.xlu1 %v1230_v4, %s1333_s8 }
  0x2d   : > { %692 = vrot.lane.b32.xlu0 %v1230_v4, %s1334_s9 }
  0x2e   : > { %537 = vrot.lane.b32.xlu1 %v1398_v12, %s1333_s8 }
  0x32   : > { %696 = vrot.lane.b32.xlu1 %v1229_v0, %s1334_s9 }
  0x36   : > { %849 = vrot.lane.b32.xlu1 %v1229_v0, %s1335_s10 }
  0x3a   : > { %847 = vrot.lane.b32.xlu1 %v1231_v3, %s1335_s10 }
  0x3e   : > { %845 = vrot.lane.b32.xlu1 %v1230_v4, %s1335_s10 }
  0x8e   : > { %v1186_v42 = vpop.permute.xlu0 %1185 }
  0x8f   : > { %v1197_v43 = vpop.permute.xlu1 %1196  ;;  %v1305_v49 = vadd.high.f32.bf16 %v282_v39, %v1186_v42  ;;  %v1306_v50 = vadd.low.f32.bf16 %v282_v39, %v1186_v42 }
  0x90   : > { %v1307_v51 = vadd.high.f32.bf16 %v482_v40, %v1197_v43  ;;  %v1308_v58 = vadd.low.f32.bf16 %v482_v40, %v1197_v43 }
  0x91   : > { %v288_v59 = vmul.f32 0.2, %v1305_v49  ;;  %v287_v60 = vmul.f32 0.2, %v1306_v50 }
  0x92   : > { %v1191_v53 = vpop.permute.xlu0 %1190  ;;  %v488_v62 = vmul.f32 0.2, %v1307_v51  ;;  %v487_v11 = vmul.f32 0.2, %v1308_v58 }
  0x93   : > { %v1202_v54 = vpop.permute.xlu1 %1201  ;;  %v1309_v63 = vadd.high.f32.bf16 %v282_v39, %v1191_v53  ;;  %v1310_v0 = vadd.low.f32.bf16 %v282_v39, %v1191_v53  ;;  %v292_v4 = vmax.f32 %v1305_v49, %v288_v59  ;;  %v291_v5 = vmax.f32 %v1306_v50, %v287_v60 }
  0x94   : > { %v1311_v3 = vadd.high.f32.bf16 %v482_v40, %v1202_v54  ;;  %v492_v10 = vmax.f32 %v1307_v51, %v488_v62  ;;  %v1312_v19 = vadd.low.f32.bf16 %v482_v40, %v1202_v54  ;;  %v491_v24 = vmax.f32 %v1308_v58, %v487_v11 }
  0x95   : > { %v290_v7 = vmul.f32 0.2, %v1309_v63  ;;  %v289_v8 = vmul.f32 0.2, %v1310_v0  ;;  %v1442_v13 = vsel %vm1422_vm5, %v292_v4, -1e+30 }
  0x96   : > { %v1446_v14 = vsel %vm1426_vm7, %v291_v5, -1e+30  ;;  %v333_v15 = vsel %vm329_vm6, %v1442_v13, -inf  ;;  %v490_v20 = vmul.f32 0.2, %v1311_v3 }
  0x97   : > { %v1208_v6 = vpop.permute.xlu0 %1207  ;;  %v330_v16 = vsel %vm329_vm6, %v1446_v14, -inf  ;;  %v294_v17 = vmax.f32 %v1309_v63, %v290_v7  ;;  %v293_v18 = vmax.f32 %v1310_v0, %v289_v8  ;;  %334 = vmax.xlane.f32.xlu0 %v333_v15  ;;  %v1466_v28 = vsel %vm1422_vm5, %v492_v10, -1e+30 }
  0x98   : > { %v1214_v9 = vpop.permute.xlu1 %1213  ;;  %331 = vmax.xlane.f32.xlu1 %v330_v16  ;;  %v1313_v21 = vadd.high.f32.bf16 %v635_v61, %v1208_v6  ;;  %v1314_v25 = vadd.low.f32.bf16 %v635_v61, %v1208_v6  ;;  %v1470_v30 = vsel %vm1426_vm7, %v491_v24, -1e+30  ;;  %v494_v34 = vmax.f32 %v1311_v3, %v490_v20 }
  0x99   : > { %v1454_v22 = vsel %vm1430_vm8, %v294_v17, -1e+30  ;;  %v1458_v23 = vsel %vm1434_vm9, %v293_v18, -1e+30  ;;  %v1315_v32 = vadd.high.f32.bf16 %v635_v61, %v1214_v9  ;;  %v1316_v33 = vadd.low.f32.bf16 %v635_v61, %v1214_v9 }
  0x9a   : > { %v339_v26 = vsel %vm329_vm6, %v1454_v22, -inf  ;;  %v336_v27 = vsel %vm329_vm6, %v1458_v23, -inf  ;;  %v489_v35 = vmul.f32 0.2, %v1312_v19  ;;  %v502_v36 = vsel %vm329_vm6, %v1466_v28, -inf }
  0x9b   : > { %340 = vmax.xlane.f32.xlu0 %v339_v26  ;;  %v641_v37 = vmul.f32 0.2, %v1313_v21  ;;  %v499_v38 = vsel %vm329_vm6, %v1470_v30, -inf  ;;  %v640_v41 = vmul.f32 0.2, %v1314_v25 }
  0x9c   : > { %v1226_v31 = vpop.permute.xlu0 %1225  ;;  %337 = vmax.xlane.f32.xlu1 %v336_v27  ;;  %v493_v40 = vmax.f32 %v1312_v19, %v489_v35  ;;  %v1480_v44 = vsel %vm1430_vm8, %v494_v34, -1e+30  ;;  %v643_v49 = vmul.f32 0.2, %v1315_v32  ;;  %v642_v50 = vmul.f32 0.2, %v1316_v33 }
  0x9d   : > { %v1220_v29 = vpop.permute.xlu1 %1219  ;;  %v645_v45 = vmax.f32 %v1313_v21, %v641_v37  ;;  %v644_v48 = vmax.f32 %v1314_v25, %v640_v41  ;;  %v508_v51 = vsel %vm329_vm6, %v1480_v44, -inf  ;;  %v1319_v54 = vadd.low.f32.bf16 %v1438_v2, %v1226_v31 }
  0x9e   : > { %v1317_v39 = vadd.high.f32.bf16 %v1438_v2, %v1220_v29  ;;  %v1318_v43 = vadd.low.f32.bf16 %v1438_v2, %v1220_v29  ;;  %v1484_v47 = vsel %vm1434_vm9, %v493_v40, -1e+30  ;;  %v647_v61 = vmax.f32 %v1315_v32, %v643_v49 }
  0x9f   : > { %503 = vmax.xlane.f32.xlu0 %v502_v36  ;;  %v505_v53 = vsel %vm329_vm6, %v1484_v47, -inf  ;;  %v1493_v58 = vsel %vm1422_vm5, %v645_v45, -1e+30  ;;  %v1497_v60 = vsel %vm1426_vm7, %v644_v48, -1e+30  ;;  %v646_v62 = vmax.f32 %v1316_v33, %v642_v50 }
  0xa0   : > { %v542_v46 = vpop.permute.xlu0 %541  ;;  %500 = vmax.xlane.f32.xlu1 %v499_v38  ;;  %v794_v59 = vmul.f32 0.2, %v1317_v39  ;;  %v793_v63 = vmul.f32 0.2, %v1318_v43  ;;  %v1320_v3 = vadd.high.f32.bf16 %v1438_v2, %v1226_v31  ;;  %v655_v4 = vsel %vm329_vm6, %v1493_v58, -inf }
  0xa1   : > { %v544_v42 = vpop.permute.xlu1 %543  ;;  %v652_v5 = vsel %vm329_vm6, %v1497_v60, -inf  ;;  %v1506_v7 = vsel %vm1430_vm8, %v647_v61, -1e+30  ;;  %v1510_v8 = vsel %vm1434_vm9, %v646_v62, -1e+30 }
  0xa2   : > { %1132 = vmatprep.subr.bf16.mxu1 %v544_v42  ;;  %v798_v6 = vmax.f32 %v1317_v39, %v794_v59  ;;  %v797_v9 = vmax.f32 %v1318_v43, %v793_v63  ;;  %v795_v10 = vmul.f32 0.2, %v1319_v54  ;;  %v661_v11 = vsel %vm329_vm6, %v1506_v7, -inf }
  0xa3   : > { %1133 = vmatpush3.bf16.msra.mxu1 %v544_v42  ;;  %509 = vmax.xlane.f32.xlu0 %v508_v51  ;;  %v658_v15 = vsel %vm329_vm6, %v1510_v8, -inf  ;;  %v796_v19 = vmul.f32 0.2, %v1320_v3 }
  0xa4   : > { %1134 = vmatprep.subr.bf16.mxu1 %v542_v46  ;;  %506 = vmax.xlane.f32.xlu1 %v505_v53  ;;  %v1521_v16 = vsel %vm1422_vm5, %v798_v6, -1e+30  ;;  %v1525_v17 = vsel %vm1426_vm7, %v797_v9, -1e+30  ;;  %v799_v18 = vmax.f32 %v1319_v54, %v795_v10  ;;  %v1552_v29 = vpop.permute.xlu0 %694 }
  0xa5   : > { %v540_v52 = vpop.permute.xlu1 %539  ;;  %v808_v21 = vsel %vm329_vm6, %v1521_v16, -inf  ;;  %v805_v24 = vsel %vm329_vm6, %v1525_v17, -inf  ;;  %v800_v56 = vmax.f32 %v1320_v3, %v796_v19 }
  0xa6   : > { %v1536_v55 = vsel %vm1434_vm9, %v799_v18, -1e+30 }
  0xa7   : > { %1135 = vmatpush3.bf16.msra.mxu1 %v542_v46  ;;  %656 = vmax.xlane.f32.xlu0 %v655_v4  ;;  %v811_v25 = vsel %vm329_vm6, %v1536_v55, -inf  ;;  %v1542_v26 = vsel %vm1430_vm8, %v800_v56, -1e+30 }
  0xa8   : > { %1136 = vmatprep.subr.bf16.mxu1 %v540_v52  ;;  %653 = vmax.xlane.f32.xlu1 %v652_v5  ;;  %v814_v27 = vsel %vm329_vm6, %v1542_v26, -inf  ;;  %v1556_v32 = vpop.permute.xlu0 %692 }
  0xa9   : > { %v538_v0 = vpop.permute.xlu1 %537 }
  0xab   : > { %1137 = vmatpush3.bf16.msra.mxu1 %v540_v52  ;;  %662 = vmax.xlane.f32.xlu0 %v661_v11 }
  0xac   : > { %1138 = vmatprep.subr.bf16.mxu1 %v538_v0  ;;  %659 = vmax.xlane.f32.xlu1 %v658_v15 }
  0xad   : > { %v1512_v2 = vpop.permute.xlu1 %696 }
  0xae   : > { %1144 = vmatprep.subr.bf16.mxu0 %v1512_v2 }
  0xaf   : > { %1139 = vmatpush3.bf16.msra.mxu1 %v538_v0  ;;  %809 = vmax.xlane.f32.xlu0 %v808_v21 }
  0xb0   : > { %806 = vmax.xlane.f32.xlu1 %v805_v24 }
  0xb1   : > { %v1527_v20 = vpop.permute.xlu1 %849 }
  0xb2   : > { %1156 = vmatprep.subr.bf16.mxu1 %v1527_v20 }
  0xb3   : > { %812 = vmax.xlane.f32.xlu0 %v811_v25 }
  0xb5   : > { %v1550_v1 = vpop.permute.xlu1 %847 }
  0xb7   : > { %815 = vmax.xlane.f32.xlu0 %v814_v27 }
  0xb9   : > { %v1554_v31 = vpop.permute.xlu1 %845 }
  0xc1   : > { %843 = vrot.lane.b32.xlu1 %v1398_v12, %s1335_s10 }
  0xcd   : > { %690 = vrot.lane.b32.xlu0 %v1398_v12, %s1334_s9 }
 0x120   : > { %v335_v57 = vpop.xlane.xlu0 %334 }
 0x121   : > { %v332_v33 = vpop.xlane.xlu1 %331  ;;  %v343_v34 = vsub.f32 %v1442_v13, %v335_v57 }
 0x122   : > { %v342_v35 = vsub.f32 %v1446_v14, %v332_v33 }
 0x123   : > { %v348_v36 = vmul.f32 1.442695, %v343_v34 }
 0x124   : > { %v346_v37 = vmul.f32 1.442695, %v342_v35  ;;  %v341_v38 = vpop.xlane.xlu0 %340 }
 0x125   : > { %v338_v39 = vpop.xlane.xlu1 %337  ;;  %1233 = vpow2.f32 %v348_v36  ;;  %v345_v12 = vsub.f32 %v1454_v22, %v341_v38 }
 0x126   : > { %v344_v40 = vsub.f32 %v1458_v23, %v338_v39  ;;  %1235 = vpow2.f32 %v346_v37 }
 0x127   : > { %v352_v41 = vmul.f32 1.442695, %v345_v12 }
 0x128   : > { %v350_v42 = vmul.f32 1.442695, %v344_v40  ;;  %v504_v43 = vpop.xlane.xlu0 %503 }
 0x129   : > { %v501_v45 = vpop.xlane.xlu1 %500  ;;  %1237 = vpow2.f32 %v352_v41  ;;  %v512_v46 = vsub.f32 %v1466_v28, %v504_v43 }
 0x12a   : > { %v511_v13 = vsub.f32 %v1470_v30, %v501_v45  ;;  %1239 = vpow2.f32 %v350_v42 }
 0x12b   : > { %v517_v14 = vmul.f32 1.442695, %v512_v46 }
 0x12c   : > { %v515_v48 = vmul.f32 1.442695, %v511_v13  ;;  %v510_v49 = vpop.xlane.xlu0 %509 }
 0x12d   : > { %v507_v50 = vpop.xlane.xlu1 %506  ;;  %1241 = vpow2.f32 %v517_v14  ;;  %v514_v22 = vsub.f32 %v1480_v44, %v510_v49 }
 0x12e   : > { %v513_v23 = vsub.f32 %v1484_v47, %v507_v50  ;;  %1243 = vpow2.f32 %v515_v48 }
 0x12f   : > { %v521_v51 = vmul.f32 1.442695, %v514_v22 }
 0x130   : > { %v519_v52 = vmul.f32 1.442695, %v513_v23  ;;  %v657_v53 = vpop.xlane.xlu0 %656 }
 0x131   : > { %v654_v54 = vpop.xlane.xlu1 %653  ;;  %1245 = vpow2.f32 %v521_v51  ;;  %v665_v28 = vsub.f32 %v1493_v58, %v657_v53 }
 0x132   : > { %v664_v30 = vsub.f32 %v1497_v60, %v654_v54  ;;  %v1234_v59 = vpop.eup %1233  ;;  %1247 = vpow2.f32 %v519_v52 }
 0x133   : > { %v1236_v61 = vpop.eup %1235  ;;  %v670_v62 = vmul.f32 1.442695, %v665_v28  ;;  %v357_v11 = vsel %vm329_vm6, %v1234_v59, 0.0 }
 0x134   : > { %v668_v63 = vmul.f32 1.442695, %v664_v30  ;;  %v663_v0 = vpop.xlane.xlu0 %662  ;;  %v354_v44 = vsel %vm329_vm6, %v1236_v61, 0.0  ;;  %v366_v47 = vpack.c.bf16 %v1234_v59, %v1236_v61 }
 0x135   : > { %v660_v3 = vpop.xlane.xlu1 %659  ;;  %1249 = vpow2.f32 %v670_v62  ;;  %v667_v4 = vsub.f32 %v1506_v7, %v663_v0  ;;  %355 = vadd.xlane.f32.xlu0 %v354_v44 }
 0x136   : > { %v666_v5 = vsub.f32 %v1510_v8, %v660_v3  ;;  %v1238_v6 = vpop.eup %1237  ;;  %1251 = vpow2.f32 %v668_v63  ;;  %1128 = vmatprep.mubr.msk.bf16.mxu0 %vm329_vm6, %v366_v47 }
 0x137   : > { %v1240_v58 = vpop.eup %1239  ;;  %v674_v60 = vmul.f32 1.442695, %v667_v4  ;;  %v363_v41 = vsel %vm329_vm6, %v1238_v6, 0.0 }
 0x138   : > { %v672_v9 = vmul.f32 1.442695, %v666_v5  ;;  %v810_v10 = vpop.xlane.xlu0 %809  ;;  %v367_v18 = vpack.c.bf16 %v1238_v6, %v1240_v58  ;;  %v360_v36 = vsel %vm329_vm6, %v1240_v58, 0.0 }
 0x139   : > { %v807_v15 = vpop.xlane.xlu1 %806  ;;  %1253 = vpow2.f32 %v674_v60  ;;  %v818_v19 = vsub.f32 %v1521_v16, %v810_v10  ;;  %358 = vadd.xlane.f32.xlu0 %v357_v11 }
 0x13a   : > { %v817_v7 = vsub.f32 %v1525_v17, %v807_v15  ;;  %v1242_v21 = vpop.eup %1241  ;;  %1255 = vpow2.f32 %v672_v9  ;;  %1129 = vmatmul.mubr.msk.bf16.vlgmr.msra.gmra.mxu0 %vm329_vm6, %v367_v18 }
 0x13b   : > { %v1244_v8 = vpop.eup %1243  ;;  %v823_v24 = vmul.f32 1.442695, %v818_v19  ;;  %1145 = vmatpush3.bf16.msra.mxu0 %v1512_v2  ;;  %v526_v25 = vsel %vm329_vm6, %v1242_v21, 0.0 }
 0x13c   : > { %v821_v56 = vmul.f32 1.442695, %v817_v7  ;;  %1146 = vmatprep.subr.bf16.mxu0 %v1552_v29  ;;  %v813_v27 = vpop.xlane.xlu0 %812  ;;  %v523_v57 = vsel %vm329_vm6, %v1244_v8, 0.0  ;;  %v535_v16 = vpack.c.bf16 %v1242_v21, %v1244_v8 }
 0x13d   : > { %1257 = vpow2.f32 %v823_v24  ;;  %v819_v17 = vsub.f32 %v1536_v55, %v813_v27  ;;  %527 = vadd.xlane.f32.xlu0 %v526_v25  ;;  %524 = vadd.xlane.f32.xlu1 %v523_v57  ;;  %v844_v13 = vpop.permute.xlu1 %843 }
 0x13e   : > { %v1246_v33 = vpop.eup %1245  ;;  %1259 = vpow2.f32 %v821_v56  ;;  %1140 = vmatprep.mubr.msk.bf16.mxu1 %vm329_vm6, %v535_v16 }
 0x13f   : > { %v1248_v34 = vpop.eup %1247  ;;  %1147 = vmatpush3.bf16.msra.mxu0 %v1552_v29  ;;  %v825_v2 = vmul.f32 1.442695, %v819_v17 }
 0x140   : > { %1148 = vmatprep.subr.bf16.mxu0 %v1556_v32  ;;  %v816_v35 = vpop.xlane.xlu0 %815  ;;  %v529_v37 = vsel %vm329_vm6, %v1248_v34, 0.0  ;;  %v536_v38 = vpack.c.bf16 %v1246_v33, %v1248_v34 }
 0x141   : > { %v820_v55 = vsub.f32 %v1542_v26, %v816_v35  ;;  %361 = vadd.xlane.f32.xlu1 %v360_v36  ;;  %530 = vadd.xlane.f32.xlu0 %v529_v37  ;;  %1261 = vpow2.f32 %v825_v2 }
 0x142   : > { %v1250_v39 = vpop.eup %1249  ;;  %1141 = vmatmul.mubr.msk.bf16.vlgmr.msra.gmra.mxu1 %vm329_vm6, %v536_v38 }
 0x143   : > { %v1252_v12 = vpop.eup %1251  ;;  %v827_v40 = vmul.f32 1.442695, %v820_v55  ;;  %1149 = vmatpush3.bf16.msra.mxu0 %v1556_v32  ;;  %1157 = vmatpush3.bf16.msra.mxu1 %v1527_v20  ;;  %v679_v20 = vsel %vm329_vm6, %v1250_v39, 0.0  ;;  %v532_v32 = vsel %vm329_vm6, %v1246_v33, 0.0 }
 0x144   : > { %1158 = vmatprep.subr.bf16.mxu1 %v1550_v1  ;;  %v691_v29 = vpop.permute.xlu0 %690  ;;  %v676_v42 = vsel %vm329_vm6, %v1252_v12, 0.0  ;;  %v688_v26 = vpack.c.bf16 %v1250_v39, %v1252_v12 }
 0x145   : > { %1263 = vpow2.f32 %v827_v40  ;;  %364 = vadd.xlane.f32.xlu0 %v363_v41  ;;  %677 = vadd.xlane.f32.xlu1 %v676_v42 }
 0x146   : > { %v1254_v43 = vpop.eup %1253  ;;  %1150 = vmatprep.subr.bf16.mxu0 %v691_v29  ;;  %1152 = vmatprep.mubr.msk.bf16.mxu0 %vm329_vm6, %v688_v26 }
 0x147   : > { %v1256_v45 = vpop.eup %1255  ;;  %1159 = vmatpush3.bf16.msra.mxu1 %v1550_v1  ;;  %1151 = vmatpush3.bf16.msra.mxu0 %v691_v29  ;;  %v685_v22 = vsel %vm329_vm6, %v1254_v43, 0.0 }
 0x148   : > { %1160 = vmatprep.subr.bf16.mxu1 %v1554_v31  ;;  %v689_v46 = vpack.c.bf16 %v1254_v43, %v1256_v45  ;;  %v682_v49 = vsel %vm329_vm6, %v1256_v45, 0.0 }
 0x149   : > { %680 = vadd.xlane.f32.xlu0 %v679_v20  ;;  %533 = vadd.xlane.f32.xlu1 %v532_v32 }
 0x14a   : > { %v1258_v14 = vpop.eup %1257  ;;  %1153 = vmatmul.mubr.msk.bf16.vlgmr.msra.gmra.mxu0 %vm329_vm6, %v689_v46 }
 0x14b   : > { %v1260_v48 = vpop.eup %1259  ;;  %1161 = vmatpush3.bf16.msra.mxu1 %v1554_v31  ;;  %v832_v23 = vsel %vm329_vm6, %v1258_v14, 0.0 }
 0x14c   : > { %v829_v1 = vsel %vm329_vm6, %v1260_v48, 0.0  ;;  %v841_v50 = vpack.c.bf16 %v1258_v14, %v1260_v48  ;;  %1162 = vmatprep.subr.bf16.mxu1 %v844_v13 }
 0x14d   : > { %683 = vadd.xlane.f32.xlu1 %v682_v49  ;;  %830 = vadd.xlane.f32.xlu0 %v829_v1 }
 0x14e   : > { %1164 = vmatprep.mubr.msk.bf16.mxu1 %vm329_vm6, %v841_v50  ;;  %v1262_v51 = vpop.eup %1261 }
 0x14f   : > { %1163 = vmatpush3.bf16.msra.mxu1 %v844_v13  ;;  %v835_v54 = vsel %vm329_vm6, %v1262_v51, 0.0 }
 0x151   : > { %686 = vadd.xlane.f32.xlu1 %v685_v22  ;;  %833 = vadd.xlane.f32.xlu0 %v832_v23 }
 0x152   : > { %v1264_v52 = vpop.eup %1263 }
 0x153   : > { %v838_v31 = vsel %vm329_vm6, %v1264_v52, 0.0  ;;  %v842_v53 = vpack.c.bf16 %v1264_v52, %v1262_v51 }
 0x155   : > { %836 = vadd.xlane.f32.xlu1 %v835_v54  ;;  %839 = vadd.xlane.f32.xlu0 %v838_v31 }
 0x156   : > { %1165 = vmatmul.mubr.msk.bf16.vlgmr.msra.gmra.mxu1 %vm329_vm6, %v842_v53 }
 0x1be   : > { %v356_v28 = vpop.xlane.xlu0 %355 }
 0x1bf   : > { %1265 = vrcp.f32 %v356_v28 }
 0x1c2   : > { %v359_v30 = vpop.xlane.xlu0 %358 }
 0x1c3   : > { %1267 = vrcp.f32 %v359_v30  ;;  %v1072_v30 = vld [vmem:[%s1627_s4] ss:$0 sm:$0xff] }
 0x1c6   : > { %v525_v59 = vpop.xlane.xlu1 %524  ;;  %v528_v61 = vpop.xlane.xlu0 %527 }
 0x1c7   : > { %1269 = vrcp.f32 %v525_v59 }
 0x1ca   : > { %v362_v62 = vpop.xlane.xlu1 %361  ;;  %v531_v63 = vpop.xlane.xlu0 %530 }
 0x1cb   : > { %1271 = vrcp.f32 %v531_v63 }
 0x1cc   : > { %1273 = vrcp.f32 %v362_v62  ;;  %v1266_v21 = vpop.eup %1265 }
 0x1ce   : > { %v678_v0 = vpop.xlane.xlu1 %677  ;;  %v365_v44 = vpop.xlane.xlu0 %364 }
 0x1cf   : > { %1275 = vrcp.f32 %v365_v44 }
 0x1d0   : > { %v1268_v24 = vpop.eup %1267 }
 0x1d2   : > { %v534_v3 = vpop.xlane.xlu1 %533  ;;  %v681_v47 = vpop.xlane.xlu0 %680 }
 0x1d4   : > { %v1270_v56 = vpop.eup %1269 }
 0x1d6   : > { %v684_v4 = vpop.xlane.xlu1 %683  ;;  %v831_v6 = vpop.xlane.xlu0 %830 }
 0x1d7   : > { %1277 = vrcp.f32 %v684_v4 }
 0x1d8   : > { %1279 = vrcp.f32 %v678_v0  ;;  %v1272_v25 = vpop.eup %1271 }
 0x1d9   : > { %1281 = vrcp.f32 %v534_v3  ;;  %v1274_v57 = vpop.eup %1273 }
 0x1da   : > { %v687_v58 = vpop.xlane.xlu1 %686  ;;  %v834_v9 = vpop.xlane.xlu0 %833 }
 0x1db   : > { %1283 = vrcp.f32 %v687_v58 }
 0x1dc   : > { %v1276_v17 = vpop.eup %1275 }
 0x1de   : > { %v837_v11 = vpop.xlane.xlu1 %836  ;;  %v840_v19 = vpop.xlane.xlu0 %839 }
 0x1df   : > { %1285 = vrcp.f32 %v837_v11 }
 0x1e0   : > { %1287 = vrcp.f32 %v528_v61 }
 0x1e1   : > { %1289 = vrcp.f32 %v831_v6 }
 0x1e2   : > { %1291 = vrcp.f32 %v681_v47 }
 0x1e3   : > { %1293 = vrcp.f32 %v840_v19 }
 0x1e4   : > { %1295 = vrcp.f32 %v834_v9  ;;  %v1278_v34 = vpop.eup %1277 }
 0x1e5   : > { %v1280_v2 = vpop.eup %1279 }
 0x1e6   : > { %v1282_v55 = vpop.eup %1281 }
 0x1e8   : > { %v1284_v12 = vpop.eup %1283 }
 0x1ec   : > { %v1286_v26 = vpop.eup %1285 }
 0x1ed   : > { %v1288_v20 = vpop.eup %1287 }
 0x1ee   : > { %v1290_v49 = vpop.eup %1289 }
 0x1ef   : > { %v1292_v22 = vpop.eup %1291 }
 0x1f0   : > { %v1294_v53 = vpop.eup %1293 }
 0x1f1   : > { %v1296_v44 = vpop.eup %1295 }
 0x1fa   : > { %v1130_v5 = vpop.f32.mrf.mxu0 }
 0x1fb   : > { %v461_v35 = vmul.f32 %v1274_v57, %v1130_v5 }
 0x1fc   : > { %v440_v60 = vpop.f32.mrf.mxu0 }
 0x1fd   : > { %v459_v40 = vmul.f32 %v1266_v21, %v440_v60 }
 0x1fe   : > { %v1131_v10 = vpop.f32.mrf.mxu0 }
 0x1ff   : > { %v462_v43 = vmul.f32 %v1276_v17, %v1131_v10 }
 0x200   : > { %v443_v18 = vpop.f32.mrf.mxu0 }
 0x201   : > { %v460_v54 = vmul.f32 %v1268_v24, %v443_v18 }
 0x202   : > { %v1142_v15 = vpop.f32.mrf.mxu1 }
 0x203   : > { %v610_v33 = vmul.f32 %v1272_v25, %v1142_v15 }
 0x204   : > { %v589_v8 = vpop.f32.mrf.mxu1 }
 0x205   : > { %v608_v36 = vmul.f32 %v1270_v56, %v589_v8  ;;  %v614_v29 = vadd.f32 %v610_v33, %v461_v35 }
 0x206   : > { %v1143_v16 = vpop.f32.mrf.mxu1 }
 0x207   : > { %v611_v41 = vmul.f32 %v1282_v55, %v1143_v16  ;;  %v612_v32 = vadd.f32 %v608_v36, %v459_v40 }
 0x208   : > { %v592_v39 = vpop.f32.mrf.mxu1 }
 0x209   : > { %v609_v1 = vmul.f32 %v1288_v20, %v592_v39  ;;  %v615_v23 = vadd.f32 %v611_v41, %v462_v43 }
 0x20a   : > { %v1154_v7 = vpop.f32.mrf.mxu0 }
 0x20b   : > { %v763_v37 = vmul.f32 %v1278_v34, %v1154_v7  ;;  %v613_v3 = vadd.f32 %v609_v1, %v460_v54 }
 0x20c   : > { %v742_v27 = vpop.f32.mrf.mxu0 }
 0x20d   : > { %v761_v42 = vmul.f32 %v1280_v2, %v742_v27  ;;  %v767_v46 = vadd.f32 %v763_v37, %v614_v29 }
 0x20e   : > { %v1155_v38 = vpop.f32.mrf.mxu0 }
 0x20f   : > { %v764_v13 = vmul.f32 %v1284_v12, %v1155_v38  ;;  %v765_v51 = vadd.f32 %v761_v42, %v612_v32 }
 0x210   : > { %v745_v14 = vpop.f32.mrf.mxu0 }
 0x211   : > { %v762_v28 = vmul.f32 %v1292_v22, %v745_v14  ;;  %v768_v61 = vadd.f32 %v764_v13, %v615_v23 }
 0x213   : > { %v766_v60 = vadd.f32 %v762_v28, %v613_v3 }
 0x216   : > { %v1166_v45 = vpop.f32.mrf.mxu1 }
 0x217   : > { %v916_v48 = vmul.f32 %v1286_v26, %v1166_v45 }
 0x218   : > { %v895_v50 = vpop.f32.mrf.mxu1 }
 0x219   : > { %v920_v52 = vadd.f32 %v916_v48, %v767_v46  ;;  %v914_v31 = vmul.f32 %v1290_v49, %v895_v50 }
 0x21a   : > { %v1167_v59 = vpop.f32.mrf.mxu1 }
 0x21b   : > { %v924_v62 = vmul.f32 0.25, %v920_v52  ;;  %v918_v63 = vadd.f32 %v914_v31, %v765_v51  ;;  %v917_v0 = vmul.f32 %v1294_v53, %v1167_v59 }
 0x21c   : > { %v898_v47 = vpop.f32.mrf.mxu1 }
 0x21d   : > { %v935_v4 = vadd.f32 %v1072_v30, %v924_v62  ;;  %v922_v5 = vmul.f32 0.25, %v918_v63  ;;  %v921_v6 = vadd.f32 %v917_v0, %v768_v61  ;;  %v915_v58 = vmul.f32 %v1296_v44, %v898_v47 }
 0x21f   : > { %v943_v9 = vmin.f32 %v935_v4, 0.0  ;;  %v933_v10 = vadd.f32 %v1072_v30, %v922_v5  ;;  %v925_v11 = vmul.f32 0.25, %v921_v6  ;;  %v919_v15 = vadd.f32 %v915_v58, %v766_v60 }
 0x220   : > { %vm939_vm12 = vcmp.gt.f32.partialorder %v935_v4, 0.0 }
 0x221   : > { %v949_v18 = vmul.f32 1.442695, %v943_v9  ;;  %v941_v19 = vmin.f32 %v933_v10, 0.0  ;;  %v936_v7 = vadd.f32 %v1072_v30, %v925_v11  ;;  %v923_v21 = vmul.f32 0.25, %v919_v15 }
 0x222   : > { %vm937_vm10 = vcmp.gt.f32.partialorder %v933_v10, 0.0 }
 0x223   : > { %v945_v8 = vmul.f32 1.442695, %v941_v19  ;;  %v944_v24 = vmin.f32 %v936_v7, 0.0  ;;  %1297 = vpow2.f32 %v949_v18  ;;  %v934_v56 = vadd.f32 %v1072_v30, %v923_v21 }
 0x224   : > { %vm940_vm13 = vcmp.gt.f32.partialorder %v936_v7, 0.0 }
 0x225   : > { %1299 = vpow2.f32 %v945_v8  ;;  %v951_v25 = vmul.f32 1.442695, %v944_v24  ;;  %v942_v27 = vmin.f32 %v934_v56, 0.0  ;;  %vm938_vm14 = vcmp.gt.f32.partialorder %v934_v56, 0.0 }
 0x227   : > { %1301 = vpow2.f32 %v951_v25  ;;  %v947_v57 = vmul.f32 1.442695, %v942_v27 }
 0x229   : > { %1303 = vpow2.f32 %v947_v57 }
 0x230   : > { %v1298_v16 = vpop.eup %1297 }
 0x231   : > { %v1075_v2 = vadd.f32 -1.0, %v1298_v16 }
 0x232   : > { %v1300_v17 = vpop.eup %1299 }
 0x233   : > { %v1073_v33 = vadd.f32 -1.0, %v1300_v17  ;;  %v959_v39 = vsel %vm939_vm12, %v935_v4, %v1075_v2 }
 0x234   : > { %v1302_v34 = vpop.eup %1301  ;;  %v1085_v41 = vpack.c.bf16 %v959_v39, %v959_v39 }
 0x235   : > { %v957_v35 = vsel %vm937_vm10, %v933_v10, %v1073_v33  ;;  %v1076_v37 = vadd.f32 -1.0, %v1302_v34 }
 0x236   : > { %v1083_v36 = vpack.c.bf16 %v957_v35, %v957_v35  ;;  %v1304_v38 = vpop.eup %1303  ;;  %980 = vst.msk [vmem:[%s243_s23 + $0x8] sm:$0xf] %vm977_vm11, %v1085_v41 }
 0x237   : > { %v1074_v55 = vadd.f32 -1.0, %v1304_v38  ;;  %v960_v12 = vsel %vm940_vm13, %v936_v7, %v1076_v37 }
 0x238   : > { %978 = vst.msk [vmem:[%s243_s23] sm:$0xf] %vm977_vm11, %v1083_v36  ;;  %v1086_v42 = vpack.c.bf16 %v960_v12, %v960_v12 }
 0x239   : > { %v958_v40 = vsel %vm938_vm14, %v934_v56, %v1074_v55 }
 0x23a   : > { %v1084_v29 = vpack.c.bf16 %v958_v40, %v958_v40  ;;  %981 = vst.msk [vmem:[%s243_s23 + $0xc] sm:$0xf] %vm977_vm11, %v1086_v42 }
 0x23c   : > { %979 = vst.msk [vmem:[%s243_s23 + $0x4] sm:$0xf] %vm977_vm11, %v1084_v29 }
 0x23d PF: > { %s15_s18 = sadd.s32 1, %s1327_s18  }
 0x23e   : > { %p12_p5 = scmp.ge.s32.totalorder %s15_s18, 4  }
 0x240   :  { %14 = sbr.rel (!%p12_p5) target bundleno = 1 (0x1), region = 73 }

// kernel: _gat_layer.3
= control target key start
LH: loop header
LB: loop body
LE: loop exit
PB: predicated region body
PF: predicated region fallthrough
CT: control target
= control target key end

     0   :  { %s1366_s18 = smov 0   ;;  %s1623_s0 = inlined_call_operand.vmem [shape: bf16[64,128], index: 0, kind: input, shape index: {}]   ;;  %s1624_s1 = inlined_call_operand.vmem [shape: bf16[64,4], index: 1, kind: input, shape index: {}]   ;;  %s1625_s2 = inlined_call_operand.vmem [shape: bf16[4,64], index: 2, kind: input, shape index: {}]   ;;  %s1626_s3 = inlined_call_operand.vmem [shape: s8[64,64], index: 3, kind: input, shape index: {}]   ;;  %s1627_s4 = inlined_call_operand.vmem [shape: f32[1,32], index: 4, kind: input, shape index: {}]   ;;  %s1628_s5 = inlined_call_operand.vmem [shape: bf16[64,32], index: 5, kind: output, shape index: {}]  }
   0x1 LB: > { %s1372_s19 = sadd.s32 4294967295, %s1327_s18   ;;  %p1054_p0 = scmp.ge.s32.totalorder %s1327_s18, 1  ;;  %s1327_s18 = sphi %s1366_s18, %s15_s18  }
   0x2   : > { %p197_p1 = scmp.lt.s32.totalorder %s1327_s18, 3 }
   0x4   : > { %p198_p2 = pnand %p1054_p0, %p197_p1 }
   0x5   : > { %s1055_s20 = sshll.u32 (!%p198_p2), %s1372_s19, 2  ;;  %s1333_s8 = smov (!%p198_p2), 96  }
   0x6   : > { %201 = sbr.rel (%p198_p2) target bundleno = 573 (0x23d), region = 40  ;;  %p230_p3 = scmp.lt.s32.totalorder (!%p198_p2), %s1055_s20, 7 }
   0x7   : > { %s1334_s9 = smov (!%p198_p2), 64   ;;  %s1335_s10 = smov (!%p198_p2), 32  }
   0x8   : > { %p235_p4 = scmp.lt.s32.totalorder (!%p198_p2), %s1372_s19, 1 }
   0xb   : > { %v1229_v0 = vld [vmem:[%s1623_s0 + $0x18] sm:$0xff]   ;;  %v1329_v1 = vmov 0   ;;  %v1330_v2 = vmov 1   ;;  %s1638_s20 = smov (!%p230_p3, %s1055_s20), 7  ;;  %v1231_v3 = vld [vmem:[%s1623_s0 + $0x10] sm:$0xff]   ;;  %v1230_v4 = vld [vmem:[%s1623_s0 + $0x8] sm:$0xff]   ;;  %v279_v25 = vlaneseq }
   0xc   : > { %1183 = vset.pattern.permute.xlu0 %v1329_v1  ;;  %1194 = vset.pattern.permute.xlu1 %v1330_v2  ;;  %s1056_s25 = sshll.u32 %s1638_s20, 2  ;;  %v1398_v12 = vld [vmem:[%s1623_s0] sm:$0xff]   ;;  %v1331_v14 = vmov 2   ;;  %v1332_v15 = vmov 3   ;;  %s1640_s19 = smov (!%p235_p4, %s1372_s19), 1  ;;  %vm329_vm6 = vcmask 523264  }
   0xd   : > { %1120 = vmatprep.subr.bf16.mxu0 %v1229_v0  ;;  %s233_s28 = scalar_lea.vmem %s1624_s1, %s1056_s25  ;;  %s1057_s11 = sshll.u32 %s1640_s19, 3  ;;  %v280_v30 = vshrl.u32 %v279_v25, 7  ;;  %v256_v31 = vld [vmem:[%s1625_s2] sm:$0x3]  ;;  %vm977_vm11 = vcmask 257024  }
   0xe   : > { %1121 = vmatpush3.bf16.msra.mxu0 %v1229_v0  ;;  %v1088_v5 = vld [vmem:[%s233_s28] sm:$0xff]   ;;  %v1095_v6 = vld [vmem:[%s233_s28 + $0x8] sm:$0xff]   ;;  %s238_s14 = scalar_lea.vmem %s1626_s3, %s1057_s11  ;;  %v257_v33 = vunpack.c.l.bf16 %v256_v31  ;;  %s243_s23 = scalar_lea.vmem %s1628_s5, %s1056_s25 }
   0xf   : > { %1122 = vmatprep.subr.bf16.mxu0 %v1231_v3  ;;  %v1089_v7 = vunpack.c.l.bf16 %v1088_v5  ;;  %v1090_v8 = vunpack.c.h.bf16 %v1088_v5  ;;  %v1093_v9 = vunpack.c.l.bf16 %v1095_v6  ;;  %v1094_v10 = vunpack.c.h.bf16 %v1095_v6  ;;  %v258_v16 = vld [vmem:[%s238_s14] sm:$0xff] }
  0x10   : > { %vm295_vm0 = vnez %v258_v16  ;;  %v281_v34 = vsub.s32 0, %v280_v30  ;;  %v481_v35 = vsub.s32 1, %v280_v30  ;;  %v634_v47 = vsub.s32 2, %v280_v30 }
  0x11   : > { %v1184_v11 = vpack.i.bf16 %v1090_v8, %v1089_v7  ;;  %v1189_v13 = vpack.i.bf16 %v1094_v10, %v1093_v9  ;;  %v296_v17 = vsel %vm295_vm0, 16843009, %v1329_v1  ;;  %v787_v52 = vsub.s32 3, %v280_v30 }
  0x12   : > { %1123 = vmatpush3.bf16.msra.mxu0 %v1231_v3  ;;  %v298_v18 = vunpack.c.1.s8 %v296_v17  ;;  %v297_v19 = vunpack.c.0.s8 %v296_v17  ;;  %v300_v20 = vunpack.c.3.s8 %v296_v17  ;;  %v299_v21 = vunpack.c.2.s8 %v296_v17 }
  0x13   : > { %1124 = vmatprep.subr.bf16.mxu0 %v1230_v4  ;;  %1185 = vperm.xlu0 %1183, %v1184_v11   ;;  %v282_v39 = vrot.slane %v257_v33, %v281_v34  ;;  %v482_v40 = vrot.slane %v257_v33, %v481_v35  ;;  %v635_v61 = vrot.slane %v257_v33, %v634_v47 }
  0x14   : > { %1196 = vperm.xlu1 %1194, %v1184_v11   ;;  %v303_v22 = vpack.c.b16 %v298_v18, %v298_v18  ;;  %v301_v23 = vpack.c.b16 %v297_v19, %v297_v19  ;;  %v307_v24 = vpack.c.b16 %v300_v20, %v300_v20  ;;  %v305_v26 = vpack.c.b16 %v299_v21, %v299_v21 }
  0x15   : > { %v1438_v2 = vrot.slane %v257_v33, %v787_v52 }
  0x16   : > { %1125 = vmatpush3.bf16.msra.mxu0 %v1230_v4  ;;  %v304_v27 = vpack.c.b8 %v303_v22, %v303_v22  ;;  %v302_v28 = vpack.c.b8 %v301_v23, %v301_v23  ;;  %v308_v29 = vpack.c.b8 %v307_v24, %v307_v24  ;;  %v306_v32 = vpack.c.b8 %v305_v26, %v305_v26 }
  0x17   : > { %1126 = vmatprep.subr.bf16.mxu0 %v1398_v12  ;;  %1190 = vperm.xlu0 %1183, %v1189_v13  }
  0x18   : > { %1201 = vperm.xlu1 %1194, %v1189_v13   ;;  %vm310_vm1 = vnez %v304_v27  ;;  %vm309_vm2 = vnez %v302_v28  ;;  %vm312_vm3 = vnez %v308_v29  ;;  %vm311_vm4 = vnez %v306_v32 }
  0x19   : > { %v314_v36 = vsel %vm310_vm1, 16843009, %v1329_v1  ;;  %v313_v37 = vsel %vm309_vm2, 16843009, %v1329_v1  ;;  %v316_v38 = vsel %vm312_vm3, 16843009, %v1329_v1 }
  0x1a   : > { %1127 = vmatpush3.bf16.msra.mxu0 %v1398_v12  ;;  %v315_v41 = vsel %vm311_vm4, 16843009, %v1329_v1  ;;  %v318_v44 = vunpack.c.0.s8 %v314_v36  ;;  %v317_v45 = vunpack.c.0.s8 %v313_v37  ;;  %v320_v46 = vunpack.c.0.s8 %v316_v38 }
  0x1b   : > { %1205 = vset.pattern.permute.xlu0 %v1331_v14  ;;  %v319_v48 = vunpack.c.0.s8 %v315_v41 }
  0x1c   : > { %1211 = vset.pattern.permute.xlu1 %v1331_v14  ;;  %1207 = vperm.xlu0 %1205, %v1184_v11   ;;  %vm1422_vm5 = vcmp.ne.s32.totalorder %v318_v44, 0  ;;  %vm1426_vm7 = vcmp.ne.s32.totalorder %v317_v45, 0  ;;  %vm1430_vm8 = vcmp.ne.s32.totalorder %v320_v46, 0 }
  0x1d   : > { %1213 = vperm.xlu1 %1211, %v1189_v13   ;;  %vm1434_vm9 = vcmp.ne.s32.totalorder %v319_v48, 0 }
  0x20   : > { %1223 = vset.pattern.permute.xlu0 %v1332_v15 }
  0x21   : > { %1217 = vset.pattern.permute.xlu1 %v1332_v15  ;;  %1225 = vperm.xlu0 %1223, %v1189_v13  }
  0x22   : > { %1219 = vperm.xlu1 %1217, %v1184_v11  }
  0x25   : > { %541 = vrot.lane.b32.xlu0 %v1231_v3, %s1333_s8 }
  0x26   : > { %543 = vrot.lane.b32.xlu1 %v1229_v0, %s1333_s8 }
  0x29   : > { %694 = vrot.lane.b32.xlu0 %v1231_v3, %s1334_s9 }
  0x2a   : > { %539 = vrot.lane.b32.xlu1 %v1230_v4, %s1333_s8 }
  0x2d   : > { %692 = vrot.lane.b32.xlu0 %v1230_v4, %s1334_s9 }
  0x2e   : > { %537 = vrot.lane.b32.xlu1 %v1398_v12, %s1333_s8 }
  0x32   : > { %696 = vrot.lane.b32.xlu1 %v1229_v0, %s1334_s9 }
  0x36   : > { %849 = vrot.lane.b32.xlu1 %v1229_v0, %s1335_s10 }
  0x3a   : > { %847 = vrot.lane.b32.xlu1 %v1231_v3, %s1335_s10 }
  0x3e   : > { %845 = vrot.lane.b32.xlu1 %v1230_v4, %s1335_s10 }
  0x8e   : > { %v1186_v42 = vpop.permute.xlu0 %1185 }
  0x8f   : > { %v1197_v43 = vpop.permute.xlu1 %1196  ;;  %v1305_v49 = vadd.high.f32.bf16 %v282_v39, %v1186_v42  ;;  %v1306_v50 = vadd.low.f32.bf16 %v282_v39, %v1186_v42 }
  0x90   : > { %v1307_v51 = vadd.high.f32.bf16 %v482_v40, %v1197_v43  ;;  %v1308_v58 = vadd.low.f32.bf16 %v482_v40, %v1197_v43 }
  0x91   : > { %v288_v59 = vmul.f32 0.2, %v1305_v49  ;;  %v287_v60 = vmul.f32 0.2, %v1306_v50 }
  0x92   : > { %v1191_v53 = vpop.permute.xlu0 %1190  ;;  %v488_v62 = vmul.f32 0.2, %v1307_v51  ;;  %v487_v11 = vmul.f32 0.2, %v1308_v58 }
  0x93   : > { %v1202_v54 = vpop.permute.xlu1 %1201  ;;  %v1309_v63 = vadd.high.f32.bf16 %v282_v39, %v1191_v53  ;;  %v1310_v0 = vadd.low.f32.bf16 %v282_v39, %v1191_v53  ;;  %v292_v4 = vmax.f32 %v1305_v49, %v288_v59  ;;  %v291_v5 = vmax.f32 %v1306_v50, %v287_v60 }
  0x94   : > { %v1311_v3 = vadd.high.f32.bf16 %v482_v40, %v1202_v54  ;;  %v492_v10 = vmax.f32 %v1307_v51, %v488_v62  ;;  %v1312_v19 = vadd.low.f32.bf16 %v482_v40, %v1202_v54  ;;  %v491_v24 = vmax.f32 %v1308_v58, %v487_v11 }
  0x95   : > { %v290_v7 = vmul.f32 0.2, %v1309_v63  ;;  %v289_v8 = vmul.f32 0.2, %v1310_v0  ;;  %v1442_v13 = vsel %vm1422_vm5, %v292_v4, -1e+30 }
  0x96   : > { %v1446_v14 = vsel %vm1426_vm7, %v291_v5, -1e+30  ;;  %v333_v15 = vsel %vm329_vm6, %v1442_v13, -inf  ;;  %v490_v20 = vmul.f32 0.2, %v1311_v3 }
  0x97   : > { %v1208_v6 = vpop.permute.xlu0 %1207  ;;  %v330_v16 = vsel %vm329_vm6, %v1446_v14, -inf  ;;  %v294_v17 = vmax.f32 %v1309_v63, %v290_v7  ;;  %v293_v18 = vmax.f32 %v1310_v0, %v289_v8  ;;  %334 = vmax.xlane.f32.xlu0 %v333_v15  ;;  %v1466_v28 = vsel %vm1422_vm5, %v492_v10, -1e+30 }
  0x98   : > { %v1214_v9 = vpop.permute.xlu1 %1213  ;;  %331 = vmax.xlane.f32.xlu1 %v330_v16  ;;  %v1313_v21 = vadd.high.f32.bf16 %v635_v61, %v1208_v6  ;;  %v1314_v25 = vadd.low.f32.bf16 %v635_v61, %v1208_v6  ;;  %v1470_v30 = vsel %vm1426_vm7, %v491_v24, -1e+30  ;;  %v494_v34 = vmax.f32 %v1311_v3, %v490_v20 }
  0x99   : > { %v1454_v22 = vsel %vm1430_vm8, %v294_v17, -1e+30  ;;  %v1458_v23 = vsel %vm1434_vm9, %v293_v18, -1e+30  ;;  %v1315_v32 = vadd.high.f32.bf16 %v635_v61, %v1214_v9  ;;  %v1316_v33 = vadd.low.f32.bf16 %v635_v61, %v1214_v9 }
  0x9a   : > { %v339_v26 = vsel %vm329_vm6, %v1454_v22, -inf  ;;  %v336_v27 = vsel %vm329_vm6, %v1458_v23, -inf  ;;  %v489_v35 = vmul.f32 0.2, %v1312_v19  ;;  %v502_v36 = vsel %vm329_vm6, %v1466_v28, -inf }
  0x9b   : > { %340 = vmax.xlane.f32.xlu0 %v339_v26  ;;  %v641_v37 = vmul.f32 0.2, %v1313_v21  ;;  %v499_v38 = vsel %vm329_vm6, %v1470_v30, -inf  ;;  %v640_v41 = vmul.f32 0.2, %v1314_v25 }
  0x9c   : > { %v1226_v31 = vpop.permute.xlu0 %1225  ;;  %337 = vmax.xlane.f32.xlu1 %v336_v27  ;;  %v493_v40 = vmax.f32 %v1312_v19, %v489_v35  ;;  %v1480_v44 = vsel %vm1430_vm8, %v494_v34, -1e+30  ;;  %v643_v49 = vmul.f32 0.2, %v1315_v32  ;;  %v642_v50 = vmul.f32 0.2, %v1316_v33 }
  0x9d   : > { %v1220_v29 = vpop.permute.xlu1 %1219  ;;  %v645_v45 = vmax.f32 %v1313_v21, %v641_v37  ;;  %v644_v48 = vmax.f32 %v1314_v25, %v640_v41  ;;  %v508_v51 = vsel %vm329_vm6, %v1480_v44, -inf  ;;  %v1319_v54 = vadd.low.f32.bf16 %v1438_v2, %v1226_v31 }
  0x9e   : > { %v1317_v39 = vadd.high.f32.bf16 %v1438_v2, %v1220_v29  ;;  %v1318_v43 = vadd.low.f32.bf16 %v1438_v2, %v1220_v29  ;;  %v1484_v47 = vsel %vm1434_vm9, %v493_v40, -1e+30  ;;  %v647_v61 = vmax.f32 %v1315_v32, %v643_v49 }
  0x9f   : > { %503 = vmax.xlane.f32.xlu0 %v502_v36  ;;  %v505_v53 = vsel %vm329_vm6, %v1484_v47, -inf  ;;  %v1493_v58 = vsel %vm1422_vm5, %v645_v45, -1e+30  ;;  %v1497_v60 = vsel %vm1426_vm7, %v644_v48, -1e+30  ;;  %v646_v62 = vmax.f32 %v1316_v33, %v642_v50 }
  0xa0   : > { %v542_v46 = vpop.permute.xlu0 %541  ;;  %500 = vmax.xlane.f32.xlu1 %v499_v38  ;;  %v794_v59 = vmul.f32 0.2, %v1317_v39  ;;  %v793_v63 = vmul.f32 0.2, %v1318_v43  ;;  %v1320_v3 = vadd.high.f32.bf16 %v1438_v2, %v1226_v31  ;;  %v655_v4 = vsel %vm329_vm6, %v1493_v58, -inf }
  0xa1   : > { %v544_v42 = vpop.permute.xlu1 %543  ;;  %v652_v5 = vsel %vm329_vm6, %v1497_v60, -inf  ;;  %v1506_v7 = vsel %vm1430_vm8, %v647_v61, -1e+30  ;;  %v1510_v8 = vsel %vm1434_vm9, %v646_v62, -1e+30 }
  0xa2   : > { %1132 = vmatprep.subr.bf16.mxu1 %v544_v42  ;;  %v798_v6 = vmax.f32 %v1317_v39, %v794_v59  ;;  %v797_v9 = vmax.f32 %v1318_v43, %v793_v63  ;;  %v795_v10 = vmul.f32 0.2, %v1319_v54  ;;  %v661_v11 = vsel %vm329_vm6, %v1506_v7, -inf }
  0xa3   : > { %1133 = vmatpush3.bf16.msra.mxu1 %v544_v42  ;;  %509 = vmax.xlane.f32.xlu0 %v508_v51  ;;  %v658_v15 = vsel %vm329_vm6, %v1510_v8, -inf  ;;  %v796_v19 = vmul.f32 0.2, %v1320_v3 }
  0xa4   : > { %1134 = vmatprep.subr.bf16.mxu1 %v542_v46  ;;  %506 = vmax.xlane.f32.xlu1 %v505_v53  ;;  %v1521_v16 = vsel %vm1422_vm5, %v798_v6, -1e+30  ;;  %v1525_v17 = vsel %vm1426_vm7, %v797_v9, -1e+30  ;;  %v799_v18 = vmax.f32 %v1319_v54, %v795_v10  ;;  %v1552_v29 = vpop.permute.xlu0 %694 }
  0xa5   : > { %v540_v52 = vpop.permute.xlu1 %539  ;;  %v808_v21 = vsel %vm329_vm6, %v1521_v16, -inf  ;;  %v805_v24 = vsel %vm329_vm6, %v1525_v17, -inf  ;;  %v800_v56 = vmax.f32 %v1320_v3, %v796_v19 }
  0xa6   : > { %v1536_v55 = vsel %vm1434_vm9, %v799_v18, -1e+30 }
  0xa7   : > { %1135 = vmatpush3.bf16.msra.mxu1 %v542_v46  ;;  %656 = vmax.xlane.f32.xlu0 %v655_v4  ;;  %v811_v25 = vsel %vm329_vm6, %v1536_v55, -inf  ;;  %v1542_v26 = vsel %vm1430_vm8, %v800_v56, -1e+30 }
  0xa8   : > { %1136 = vmatprep.subr.bf16.mxu1 %v540_v52  ;;  %653 = vmax.xlane.f32.xlu1 %v652_v5  ;;  %v814_v27 = vsel %vm329_vm6, %v1542_v26, -inf  ;;  %v1556_v32 = vpop.permute.xlu0 %692 }
  0xa9   : > { %v538_v0 = vpop.permute.xlu1 %537 }
  0xab   : > { %1137 = vmatpush3.bf16.msra.mxu1 %v540_v52  ;;  %662 = vmax.xlane.f32.xlu0 %v661_v11 }
  0xac   : > { %1138 = vmatprep.subr.bf16.mxu1 %v538_v0  ;;  %659 = vmax.xlane.f32.xlu1 %v658_v15 }
  0xad   : > { %v1512_v2 = vpop.permute.xlu1 %696 }
  0xae   : > { %1144 = vmatprep.subr.bf16.mxu0 %v1512_v2 }
  0xaf   : > { %1139 = vmatpush3.bf16.msra.mxu1 %v538_v0  ;;  %809 = vmax.xlane.f32.xlu0 %v808_v21 }
  0xb0   : > { %806 = vmax.xlane.f32.xlu1 %v805_v24 }
  0xb1   : > { %v1527_v20 = vpop.permute.xlu1 %849 }
  0xb2   : > { %1156 = vmatprep.subr.bf16.mxu1 %v1527_v20 }
  0xb3   : > { %812 = vmax.xlane.f32.xlu0 %v811_v25 }
  0xb5   : > { %v1550_v1 = vpop.permute.xlu1 %847 }
  0xb7   : > { %815 = vmax.xlane.f32.xlu0 %v814_v27 }
  0xb9   : > { %v1554_v31 = vpop.permute.xlu1 %845 }
  0xc1   : > { %843 = vrot.lane.b32.xlu1 %v1398_v12, %s1335_s10 }
  0xcd   : > { %690 = vrot.lane.b32.xlu0 %v1398_v12, %s1334_s9 }
 0x120   : > { %v335_v57 = vpop.xlane.xlu0 %334 }
 0x121   : > { %v332_v33 = vpop.xlane.xlu1 %331  ;;  %v343_v34 = vsub.f32 %v1442_v13, %v335_v57 }
 0x122   : > { %v342_v35 = vsub.f32 %v1446_v14, %v332_v33 }
 0x123   : > { %v348_v36 = vmul.f32 1.442695, %v343_v34 }
 0x124   : > { %v346_v37 = vmul.f32 1.442695, %v342_v35  ;;  %v341_v38 = vpop.xlane.xlu0 %340 }
 0x125   : > { %v338_v39 = vpop.xlane.xlu1 %337  ;;  %1233 = vpow2.f32 %v348_v36  ;;  %v345_v12 = vsub.f32 %v1454_v22, %v341_v38 }
 0x126   : > { %v344_v40 = vsub.f32 %v1458_v23, %v338_v39  ;;  %1235 = vpow2.f32 %v346_v37 }
 0x127   : > { %v352_v41 = vmul.f32 1.442695, %v345_v12 }
 0x128   : > { %v350_v42 = vmul.f32 1.442695, %v344_v40  ;;  %v504_v43 = vpop.xlane.xlu0 %503 }
 0x129   : > { %v501_v45 = vpop.xlane.xlu1 %500  ;;  %1237 = vpow2.f32 %v352_v41  ;;  %v512_v46 = vsub.f32 %v1466_v28, %v504_v43 }
 0x12a   : > { %v511_v13 = vsub.f32 %v1470_v30, %v501_v45  ;;  %1239 = vpow2.f32 %v350_v42 }
 0x12b   : > { %v517_v14 = vmul.f32 1.442695, %v512_v46 }
 0x12c   : > { %v515_v48 = vmul.f32 1.442695, %v511_v13  ;;  %v510_v49 = vpop.xlane.xlu0 %509 }
 0x12d   : > { %v507_v50 = vpop.xlane.xlu1 %506  ;;  %1241 = vpow2.f32 %v517_v14  ;;  %v514_v22 = vsub.f32 %v1480_v44, %v510_v49 }
 0x12e   : > { %v513_v23 = vsub.f32 %v1484_v47, %v507_v50  ;;  %1243 = vpow2.f32 %v515_v48 }
 0x12f   : > { %v521_v51 = vmul.f32 1.442695, %v514_v22 }
 0x130   : > { %v519_v52 = vmul.f32 1.442695, %v513_v23  ;;  %v657_v53 = vpop.xlane.xlu0 %656 }
 0x131   : > { %v654_v54 = vpop.xlane.xlu1 %653  ;;  %1245 = vpow2.f32 %v521_v51  ;;  %v665_v28 = vsub.f32 %v1493_v58, %v657_v53 }
 0x132   : > { %v664_v30 = vsub.f32 %v1497_v60, %v654_v54  ;;  %v1234_v59 = vpop.eup %1233  ;;  %1247 = vpow2.f32 %v519_v52 }
 0x133   : > { %v1236_v61 = vpop.eup %1235  ;;  %v670_v62 = vmul.f32 1.442695, %v665_v28  ;;  %v357_v11 = vsel %vm329_vm6, %v1234_v59, 0.0 }
 0x134   : > { %v668_v63 = vmul.f32 1.442695, %v664_v30  ;;  %v663_v0 = vpop.xlane.xlu0 %662  ;;  %v354_v44 = vsel %vm329_vm6, %v1236_v61, 0.0  ;;  %v366_v47 = vpack.c.bf16 %v1234_v59, %v1236_v61 }
 0x135   : > { %v660_v3 = vpop.xlane.xlu1 %659  ;;  %1249 = vpow2.f32 %v670_v62  ;;  %v667_v4 = vsub.f32 %v1506_v7, %v663_v0  ;;  %355 = vadd.xlane.f32.xlu0 %v354_v44 }
 0x136   : > { %v666_v5 = vsub.f32 %v1510_v8, %v660_v3  ;;  %v1238_v6 = vpop.eup %1237  ;;  %1251 = vpow2.f32 %v668_v63  ;;  %1128 = vmatprep.mubr.msk.bf16.mxu0 %vm329_vm6, %v366_v47 }
 0x137   : > { %v1240_v58 = vpop.eup %1239  ;;  %v674_v60 = vmul.f32 1.442695, %v667_v4  ;;  %v363_v41 = vsel %vm329_vm6, %v1238_v6, 0.0 }
 0x138   : > { %v672_v9 = vmul.f32 1.442695, %v666_v5  ;;  %v810_v10 = vpop.xlane.xlu0 %809  ;;  %v367_v18 = vpack.c.bf16 %v1238_v6, %v1240_v58  ;;  %v360_v36 = vsel %vm329_vm6, %v1240_v58, 0.0 }
 0x139   : > { %v807_v15 = vpop.xlane.xlu1 %806  ;;  %1253 = vpow2.f32 %v674_v60  ;;  %v818_v19 = vsub.f32 %v1521_v16, %v810_v10  ;;  %358 = vadd.xlane.f32.xlu0 %v357_v11 }
 0x13a   : > { %v817_v7 = vsub.f32 %v1525_v17, %v807_v15  ;;  %v1242_v21 = vpop.eup %1241  ;;  %1255 = vpow2.f32 %v672_v9  ;;  %1129 = vmatmul.mubr.msk.bf16.vlgmr.msra.gmra.mxu0 %vm329_vm6, %v367_v18 }
 0x13b   : > { %v1244_v8 = vpop.eup %1243  ;;  %v823_v24 = vmul.f32 1.442695, %v818_v19  ;;  %1145 = vmatpush3.bf16.msra.mxu0 %v1512_v2  ;;  %v526_v25 = vsel %vm329_vm6, %v1242_v21, 0.0 }
 0x13c   : > { %v821_v56 = vmul.f32 1.442695, %v817_v7  ;;  %1146 = vmatprep.subr.bf16.mxu0 %v1552_v29  ;;  %v813_v27 = vpop.xlane.xlu0 %812  ;;  %v523_v57 = vsel %vm329_vm6, %v1244_v8, 0.0  ;;  %v535_v16 = vpack.c.bf16 %v1242_v21, %v1244_v8 }
 0x13d   : > { %1257 = vpow2.f32 %v823_v24  ;;  %v819_v17 = vsub.f32 %v1536_v55, %v813_v27  ;;  %527 = vadd.xlane.f32.xlu0 %v526_v25  ;;  %524 = vadd.xlane.f32.xlu1 %v523_v57  ;;  %v844_v13 = vpop.permute.xlu1 %843 }
 0x13e   : > { %v1246_v33 = vpop.eup %1245  ;;  %1259 = vpow2.f32 %v821_v56  ;;  %1140 = vmatprep.mubr.msk.bf16.mxu1 %vm329_vm6, %v535_v16 }
 0x13f   : > { %v1248_v34 = vpop.eup %1247  ;;  %1147 = vmatpush3.bf16.msra.mxu0 %v1552_v29  ;;  %v825_v2 = vmul.f32 1.442695, %v819_v17 }
 0x140   : > { %1148 = vmatprep.subr.bf16.mxu0 %v1556_v32  ;;  %v816_v35 = vpop.xlane.xlu0 %815  ;;  %v529_v37 = vsel %vm329_vm6, %v1248_v34, 0.0  ;;  %v536_v38 = vpack.c.bf16 %v1246_v33, %v1248_v34 }
 0x141   : > { %v820_v55 = vsub.f32 %v1542_v26, %v816_v35  ;;  %361 = vadd.xlane.f32.xlu1 %v360_v36  ;;  %530 = vadd.xlane.f32.xlu0 %v529_v37  ;;  %1261 = vpow2.f32 %v825_v2 }
 0x142   : > { %v1250_v39 = vpop.eup %1249  ;;  %1141 = vmatmul.mubr.msk.bf16.vlgmr.msra.gmra.mxu1 %vm329_vm6, %v536_v38 }
 0x143   : > { %v1252_v12 = vpop.eup %1251  ;;  %v827_v40 = vmul.f32 1.442695, %v820_v55  ;;  %1149 = vmatpush3.bf16.msra.mxu0 %v1556_v32  ;;  %1157 = vmatpush3.bf16.msra.mxu1 %v1527_v20  ;;  %v679_v20 = vsel %vm329_vm6, %v1250_v39, 0.0  ;;  %v532_v32 = vsel %vm329_vm6, %v1246_v33, 0.0 }
 0x144   : > { %1158 = vmatprep.subr.bf16.mxu1 %v1550_v1  ;;  %v691_v29 = vpop.permute.xlu0 %690  ;;  %v676_v42 = vsel %vm329_vm6, %v1252_v12, 0.0  ;;  %v688_v26 = vpack.c.bf16 %v1250_v39, %v1252_v12 }
 0x145   : > { %1263 = vpow2.f32 %v827_v40  ;;  %364 = vadd.xlane.f32.xlu0 %v363_v41  ;;  %677 = vadd.xlane.f32.xlu1 %v676_v42 }
 0x146   : > { %v1254_v43 = vpop.eup %1253  ;;  %1150 = vmatprep.subr.bf16.mxu0 %v691_v29  ;;  %1152 = vmatprep.mubr.msk.bf16.mxu0 %vm329_vm6, %v688_v26 }
 0x147   : > { %v1256_v45 = vpop.eup %1255  ;;  %1159 = vmatpush3.bf16.msra.mxu1 %v1550_v1  ;;  %1151 = vmatpush3.bf16.msra.mxu0 %v691_v29  ;;  %v685_v22 = vsel %vm329_vm6, %v1254_v43, 0.0 }
 0x148   : > { %1160 = vmatprep.subr.bf16.mxu1 %v1554_v31  ;;  %v689_v46 = vpack.c.bf16 %v1254_v43, %v1256_v45  ;;  %v682_v49 = vsel %vm329_vm6, %v1256_v45, 0.0 }
 0x149   : > { %680 = vadd.xlane.f32.xlu0 %v679_v20  ;;  %533 = vadd.xlane.f32.xlu1 %v532_v32 }
 0x14a   : > { %v1258_v14 = vpop.eup %1257  ;;  %1153 = vmatmul.mubr.msk.bf16.vlgmr.msra.gmra.mxu0 %vm329_vm6, %v689_v46 }
 0x14b   : > { %v1260_v48 = vpop.eup %1259  ;;  %1161 = vmatpush3.bf16.msra.mxu1 %v1554_v31  ;;  %v832_v23 = vsel %vm329_vm6, %v1258_v14, 0.0 }
 0x14c   : > { %v829_v1 = vsel %vm329_vm6, %v1260_v48, 0.0  ;;  %v841_v50 = vpack.c.bf16 %v1258_v14, %v1260_v48  ;;  %1162 = vmatprep.subr.bf16.mxu1 %v844_v13 }
 0x14d   : > { %683 = vadd.xlane.f32.xlu1 %v682_v49  ;;  %830 = vadd.xlane.f32.xlu0 %v829_v1 }
 0x14e   : > { %1164 = vmatprep.mubr.msk.bf16.mxu1 %vm329_vm6, %v841_v50  ;;  %v1262_v51 = vpop.eup %1261 }
 0x14f   : > { %1163 = vmatpush3.bf16.msra.mxu1 %v844_v13  ;;  %v835_v54 = vsel %vm329_vm6, %v1262_v51, 0.0 }
 0x151   : > { %686 = vadd.xlane.f32.xlu1 %v685_v22  ;;  %833 = vadd.xlane.f32.xlu0 %v832_v23 }
 0x152   : > { %v1264_v52 = vpop.eup %1263 }
 0x153   : > { %v838_v31 = vsel %vm329_vm6, %v1264_v52, 0.0  ;;  %v842_v53 = vpack.c.bf16 %v1264_v52, %v1262_v51 }
 0x155   : > { %836 = vadd.xlane.f32.xlu1 %v835_v54  ;;  %839 = vadd.xlane.f32.xlu0 %v838_v31 }
 0x156   : > { %1165 = vmatmul.mubr.msk.bf16.vlgmr.msra.gmra.mxu1 %vm329_vm6, %v842_v53 }
 0x1be   : > { %v356_v28 = vpop.xlane.xlu0 %355 }
 0x1bf   : > { %1265 = vrcp.f32 %v356_v28 }
 0x1c2   : > { %v359_v30 = vpop.xlane.xlu0 %358 }
 0x1c3   : > { %1267 = vrcp.f32 %v359_v30  ;;  %v1072_v30 = vld [vmem:[%s1627_s4] ss:$0 sm:$0xff] }
 0x1c6   : > { %v525_v59 = vpop.xlane.xlu1 %524  ;;  %v528_v61 = vpop.xlane.xlu0 %527 }
 0x1c7   : > { %1269 = vrcp.f32 %v525_v59 }
 0x1ca   : > { %v362_v62 = vpop.xlane.xlu1 %361  ;;  %v531_v63 = vpop.xlane.xlu0 %530 }
 0x1cb   : > { %1271 = vrcp.f32 %v531_v63 }
 0x1cc   : > { %1273 = vrcp.f32 %v362_v62  ;;  %v1266_v21 = vpop.eup %1265 }
 0x1ce   : > { %v678_v0 = vpop.xlane.xlu1 %677  ;;  %v365_v44 = vpop.xlane.xlu0 %364 }
 0x1cf   : > { %1275 = vrcp.f32 %v365_v44 }
 0x1d0   : > { %v1268_v24 = vpop.eup %1267 }
 0x1d2   : > { %v534_v3 = vpop.xlane.xlu1 %533  ;;  %v681_v47 = vpop.xlane.xlu0 %680 }
 0x1d4   : > { %v1270_v56 = vpop.eup %1269 }
 0x1d6   : > { %v684_v4 = vpop.xlane.xlu1 %683  ;;  %v831_v6 = vpop.xlane.xlu0 %830 }
 0x1d7   : > { %1277 = vrcp.f32 %v684_v4 }
 0x1d8   : > { %1279 = vrcp.f32 %v678_v0  ;;  %v1272_v25 = vpop.eup %1271 }
 0x1d9   : > { %1281 = vrcp.f32 %v534_v3  ;;  %v1274_v57 = vpop.eup %1273 }
 0x1da   : > { %v687_v58 = vpop.xlane.xlu1 %686  ;;  %v834_v9 = vpop.xlane.xlu0 %833 }
 0x1db   : > { %1283 = vrcp.f32 %v687_v58 }
 0x1dc   : > { %v1276_v17 = vpop.eup %1275 }
 0x1de   : > { %v837_v11 = vpop.xlane.xlu1 %836  ;;  %v840_v19 = vpop.xlane.xlu0 %839 }
 0x1df   : > { %1285 = vrcp.f32 %v837_v11 }
 0x1e0   : > { %1287 = vrcp.f32 %v528_v61 }
 0x1e1   : > { %1289 = vrcp.f32 %v831_v6 }
 0x1e2   : > { %1291 = vrcp.f32 %v681_v47 }
 0x1e3   : > { %1293 = vrcp.f32 %v840_v19 }
 0x1e4   : > { %1295 = vrcp.f32 %v834_v9  ;;  %v1278_v34 = vpop.eup %1277 }
 0x1e5   : > { %v1280_v2 = vpop.eup %1279 }
 0x1e6   : > { %v1282_v55 = vpop.eup %1281 }
 0x1e8   : > { %v1284_v12 = vpop.eup %1283 }
 0x1ec   : > { %v1286_v26 = vpop.eup %1285 }
 0x1ed   : > { %v1288_v20 = vpop.eup %1287 }
 0x1ee   : > { %v1290_v49 = vpop.eup %1289 }
 0x1ef   : > { %v1292_v22 = vpop.eup %1291 }
 0x1f0   : > { %v1294_v53 = vpop.eup %1293 }
 0x1f1   : > { %v1296_v44 = vpop.eup %1295 }
 0x1fa   : > { %v1130_v5 = vpop.f32.mrf.mxu0 }
 0x1fb   : > { %v461_v35 = vmul.f32 %v1274_v57, %v1130_v5 }
 0x1fc   : > { %v440_v60 = vpop.f32.mrf.mxu0 }
 0x1fd   : > { %v459_v40 = vmul.f32 %v1266_v21, %v440_v60 }
 0x1fe   : > { %v1131_v10 = vpop.f32.mrf.mxu0 }
 0x1ff   : > { %v462_v43 = vmul.f32 %v1276_v17, %v1131_v10 }
 0x200   : > { %v443_v18 = vpop.f32.mrf.mxu0 }
 0x201   : > { %v460_v54 = vmul.f32 %v1268_v24, %v443_v18 }
 0x202   : > { %v1142_v15 = vpop.f32.mrf.mxu1 }
 0x203   : > { %v610_v33 = vmul.f32 %v1272_v25, %v1142_v15 }
 0x204   : > { %v589_v8 = vpop.f32.mrf.mxu1 }
 0x205   : > { %v608_v36 = vmul.f32 %v1270_v56, %v589_v8  ;;  %v614_v29 = vadd.f32 %v610_v33, %v461_v35 }
 0x206   : > { %v1143_v16 = vpop.f32.mrf.mxu1 }
 0x207   : > { %v611_v41 = vmul.f32 %v1282_v55, %v1143_v16  ;;  %v612_v32 = vadd.f32 %v608_v36, %v459_v40 }
 0x208   : > { %v592_v39 = vpop.f32.mrf.mxu1 }
 0x209   : > { %v609_v1 = vmul.f32 %v1288_v20, %v592_v39  ;;  %v615_v23 = vadd.f32 %v611_v41, %v462_v43 }
 0x20a   : > { %v1154_v7 = vpop.f32.mrf.mxu0 }
 0x20b   : > { %v763_v37 = vmul.f32 %v1278_v34, %v1154_v7  ;;  %v613_v3 = vadd.f32 %v609_v1, %v460_v54 }
 0x20c   : > { %v742_v27 = vpop.f32.mrf.mxu0 }
 0x20d   : > { %v761_v42 = vmul.f32 %v1280_v2, %v742_v27  ;;  %v767_v46 = vadd.f32 %v763_v37, %v614_v29 }
 0x20e   : > { %v1155_v38 = vpop.f32.mrf.mxu0 }
 0x20f   : > { %v764_v13 = vmul.f32 %v1284_v12, %v1155_v38  ;;  %v765_v51 = vadd.f32 %v761_v42, %v612_v32 }
 0x210   : > { %v745_v14 = vpop.f32.mrf.mxu0 }
 0x211   : > { %v762_v28 = vmul.f32 %v1292_v22, %v745_v14  ;;  %v768_v61 = vadd.f32 %v764_v13, %v615_v23 }
 0x213   : > { %v766_v60 = vadd.f32 %v762_v28, %v613_v3 }
 0x216   : > { %v1166_v45 = vpop.f32.mrf.mxu1 }
 0x217   : > { %v916_v48 = vmul.f32 %v1286_v26, %v1166_v45 }
 0x218   : > { %v895_v50 = vpop.f32.mrf.mxu1 }
 0x219   : > { %v920_v52 = vadd.f32 %v916_v48, %v767_v46  ;;  %v914_v31 = vmul.f32 %v1290_v49, %v895_v50 }
 0x21a   : > { %v1167_v59 = vpop.f32.mrf.mxu1 }
 0x21b   : > { %v924_v62 = vmul.f32 0.25, %v920_v52  ;;  %v918_v63 = vadd.f32 %v914_v31, %v765_v51  ;;  %v917_v0 = vmul.f32 %v1294_v53, %v1167_v59 }
 0x21c   : > { %v898_v47 = vpop.f32.mrf.mxu1 }
 0x21d   : > { %v935_v4 = vadd.f32 %v1072_v30, %v924_v62  ;;  %v922_v5 = vmul.f32 0.25, %v918_v63  ;;  %v921_v6 = vadd.f32 %v917_v0, %v768_v61  ;;  %v915_v58 = vmul.f32 %v1296_v44, %v898_v47 }
 0x21f   : > { %v943_v9 = vmin.f32 %v935_v4, 0.0  ;;  %v933_v10 = vadd.f32 %v1072_v30, %v922_v5  ;;  %v925_v11 = vmul.f32 0.25, %v921_v6  ;;  %v919_v15 = vadd.f32 %v915_v58, %v766_v60 }
 0x220   : > { %vm939_vm12 = vcmp.gt.f32.partialorder %v935_v4, 0.0 }
 0x221   : > { %v949_v18 = vmul.f32 1.442695, %v943_v9  ;;  %v941_v19 = vmin.f32 %v933_v10, 0.0  ;;  %v936_v7 = vadd.f32 %v1072_v30, %v925_v11  ;;  %v923_v21 = vmul.f32 0.25, %v919_v15 }
 0x222   : > { %vm937_vm10 = vcmp.gt.f32.partialorder %v933_v10, 0.0 }
 0x223   : > { %v945_v8 = vmul.f32 1.442695, %v941_v19  ;;  %v944_v24 = vmin.f32 %v936_v7, 0.0  ;;  %1297 = vpow2.f32 %v949_v18  ;;  %v934_v56 = vadd.f32 %v1072_v30, %v923_v21 }
 0x224   : > { %vm940_vm13 = vcmp.gt.f32.partialorder %v936_v7, 0.0 }
 0x225   : > { %1299 = vpow2.f32 %v945_v8  ;;  %v951_v25 = vmul.f32 1.442695, %v944_v24  ;;  %v942_v27 = vmin.f32 %v934_v56, 0.0  ;;  %vm938_vm14 = vcmp.gt.f32.partialorder %v934_v56, 0.0 }
 0x227   : > { %1301 = vpow2.f32 %v951_v25  ;;  %v947_v57 = vmul.f32 1.442695, %v942_v27 }
 0x229   : > { %1303 = vpow2.f32 %v947_v57 }
 0x230   : > { %v1298_v16 = vpop.eup %1297 }
 0x231   : > { %v1075_v2 = vadd.f32 -1.0, %v1298_v16 }
 0x232   : > { %v1300_v17 = vpop.eup %1299 }
 0x233   : > { %v1073_v33 = vadd.f32 -1.0, %v1300_v17  ;;  %v959_v39 = vsel %vm939_vm12, %v935_v4, %v1075_v2 }
 0x234   : > { %v1302_v34 = vpop.eup %1301  ;;  %v1085_v41 = vpack.c.bf16 %v959_v39, %v959_v39 }
 0x235   : > { %v957_v35 = vsel %vm937_vm10, %v933_v10, %v1073_v33  ;;  %v1076_v37 = vadd.f32 -1.0, %v1302_v34 }
 0x236   : > { %v1083_v36 = vpack.c.bf16 %v957_v35, %v957_v35  ;;  %v1304_v38 = vpop.eup %1303  ;;  %980 = vst.msk [vmem:[%s243_s23 + $0x8] sm:$0xf] %vm977_vm11, %v1085_v41 }
 0x237   : > { %v1074_v55 = vadd.f32 -1.0, %v1304_v38  ;;  %v960_v12 = vsel %vm940_vm13, %v936_v7, %v1076_v37 }
 0x238   : > { %978 = vst.msk [vmem:[%s243_s23] sm:$0xf] %vm977_vm11, %v1083_v36  ;;  %v1086_v42 = vpack.c.bf16 %v960_v12, %v960_v12 }
 0x239   : > { %v958_v40 = vsel %vm938_vm14, %v934_v56, %v1074_v55 }
 0x23a   : > { %v1084_v29 = vpack.c.bf16 %v958_v40, %v958_v40  ;;  %981 = vst.msk [vmem:[%s243_s23 + $0xc] sm:$0xf] %vm977_vm11, %v1086_v42 }
 0x23c   : > { %979 = vst.msk [vmem:[%s243_s23 + $0x4] sm:$0xf] %vm977_vm11, %v1084_v29 }
 0x23d PF: > { %s15_s18 = sadd.s32 1, %s1327_s18  }
 0x23e   : > { %p12_p5 = scmp.ge.s32.totalorder %s15_s18, 4  }
 0x240   :  { %14 = sbr.rel (!%p12_p5) target bundleno = 1 (0x1), region = 73 }

// kernel: _gat_layer.2
= control target key start
LH: loop header
LB: loop body
LE: loop exit
PB: predicated region body
PF: predicated region fallthrough
CT: control target
= control target key end

     0   :  { %s678_s15 = smov 0   ;;  %s730_s0 = inlined_call_operand.vmem [shape: bf16[64,8], index: 0, kind: input, shape index: {}]   ;;  %s731_s1 = inlined_call_operand.vmem [shape: bf16[8,128], index: 1, kind: input, shape index: {}]   ;;  %s732_s2 = inlined_call_operand.vmem [shape: bf16[128,8], index: 2, kind: input, shape index: {}]   ;;  %s733_s3 = inlined_call_operand.vmem [shape: bf16[64,128], index: 3, kind: output, shape index: {0}]   ;;  %s734_s4 = inlined_call_operand.vmem [shape: bf16[64,8], index: 4, kind: output, shape index: {1}]  }
   0x1 LB: > { %s535_s16 = sadd.s32 4294967295, %s651_s15   ;;  %p539_p0 = scmp.ge.s32.totalorder %s651_s15, 1  ;;  %s651_s15 = sphi %s678_s15, %s15_s15  }
   0x2   : > { %p166_p1 = scmp.lt.s32.totalorder %s651_s15, 3 }
   0x4   : > { %p167_p2 = pnand %p539_p0, %p166_p1 }
   0x5   : > { %s540_s19 = sshll.u32 (!%p167_p2), %s535_s16, 2 }
   0x6   : > { %170 = sbr.rel (%p167_p2) target bundleno = 420 (0x1a4), region = 32  ;;  %p198_p3 = scmp.lt.s32.totalorder (!%p167_p2), %s540_s19, 7 }
   0xb   : > { %v220_v0 = vld [vmem:[%s731_s1] sm:$0xf]  ;;  %vm238_vm0 = vcmask 1043456   ;;  %v637_v1 = vld [vmem:[%s732_s2 + $0x38] sm:$0xff]   ;;  %v638_v3 = vld [vmem:[%s732_s2 + $0x30] sm:$0xff]   ;;  %s736_s19 = smov (!%p198_p3, %s540_s19), 7 }
   0xc   : > { %626 = vmatprep.subr.msk.bf16.mxu0 %vm238_vm0, %v220_v0  ;;  %v240_v2 = vsel %vm238_vm0, %v220_v0, 0  ;;  %606 = vmatprep.subr.bf16.mxu1 %v637_v1  ;;  %v639_v4 = vld [vmem:[%s732_s2 + $0x28] sm:$0xff]   ;;  %s698_s26 = sshll.u32 %s736_s19, 2  ;;  %vm231_vm1 = vcmask 64512   ;;  %v640_v5 = vld [vmem:[%s732_s2 + $0x20] sm:$0xff]   ;;  %v641_v8 = vld [vmem:[%s732_s2 + $0x18] sm:$0xff]  }
   0xd   : > { %601 = vmatpush3.bf16.msra.mxu0 %v240_v2  ;;  %607 = vmatpush3.bf16.msra.mxu1 %v637_v1  ;;  %s201_s29 = scalar_lea.vmem %s730_s0, %s698_s26  ;;  %v642_v9 = vld [vmem:[%s732_s2 + $0x10] sm:$0xff]   ;;  %v643_v10 = vld [vmem:[%s732_s2 + $0x8] sm:$0xff]   ;;  %v644_v11 = vld [vmem:[%s732_s2] sm:$0xff]   ;;  %s207_s17 = scalar_lea.vmem %s733_s3, %s698_s26  ;;  %vm440_vm2 = vcmask 60416  }
   0xe   : > { %608 = vmatprep.subr.bf16.mxu1 %v638_v3  ;;  %v635_v6 = vld [vmem:[%s201_s29] sm:$0xff]   ;;  %v636_v7 = vld [vmem:[%s201_s29 + $0x8] sm:$0xff]   ;;  %s213_s20 = scalar_lea.vmem %s734_s4, %s698_s26 }
   0xf   : > { %602 = vmatprep.mubr.msk.bf16.mxu0 %vm231_vm1, %v635_v6 }
  0x10   : > { %603 = vmatmul.mubr.msk.bf16.vlgmr.msra.gmra.mxu0 %vm231_vm1, %v636_v7 }
  0x11   : > { %609 = vmatpush3.bf16.msra.mxu1 %v638_v3 }
  0x12   : > { %610 = vmatprep.subr.bf16.mxu1 %v639_v4 }
  0x15   : > { %611 = vmatpush3.bf16.msra.mxu1 %v639_v4 }
  0x16   : > { %612 = vmatprep.subr.bf16.mxu1 %v640_v5 }
  0x19   : > { %613 = vmatpush3.bf16.msra.mxu1 %v640_v5 }
  0x1a   : > { %614 = vmatprep.subr.bf16.mxu1 %v641_v8 }
  0x1d   : > { %615 = vmatpush3.bf16.msra.mxu1 %v641_v8 }
  0x1e   : > { %616 = vmatprep.subr.bf16.mxu1 %v642_v9 }
  0x21   : > { %617 = vmatpush3.bf16.msra.mxu1 %v642_v9 }
  0x22   : > { %618 = vmatprep.subr.bf16.mxu1 %v643_v10 }
  0x25   : > { %619 = vmatpush3.bf16.msra.mxu1 %v643_v10 }
  0x26   : > { %620 = vmatprep.subr.bf16.mxu1 %v644_v11 }
  0x29   : > { %621 = vmatpush3.bf16.msra.mxu1 %v644_v11 }
  0xd0   : > { %v604_v12 = vpop.f32.mrf.mxu0 }
  0xd2   : > { %v276_v13 = vpop.f32.mrf.mxu0 }
  0xd4   : > { %v605_v14 = vpop.f32.mrf.mxu0 }
  0xd5   : > { %v292_v17 = vpack.c.bf16 %v605_v14, %v604_v12 }
  0xd6   : > { %v279_v15 = vpop.f32.mrf.mxu0 }
  0xd7   : > { %v291_v16 = vpack.c.bf16 %v279_v15, %v276_v13  ;;  %586 = vst [vmem:[%s207_s17 + $0x8] sm:$0xff] %v292_v17  }
  0xd9   : > { %580 = vst [vmem:[%s207_s17] sm:$0xff] %v291_v16   ;;  %622 = vmatprep.mubr.bf16.mxu1 %v291_v16 }
  0xda   : > { %623 = vmatmul.mubr.bf16.vlgmr.msra.gmra.mxu1 %v292_v17 }
 0x19a   : > { %v624_v18 = vpop.f32.mrf.mxu1 }
 0x19b   : > { %v574_v24 = vpack.c.bf16 %v624_v18, %v624_v18 }
 0x19c   : > { %v409_v19 = vpop.f32.mrf.mxu1 }
 0x19d   : > { %v572_v20 = vpack.c.bf16 %v409_v19, %v409_v19  ;;  %443 = vst.msk [vmem:[%s213_s20 + $0x8] sm:$0xf] %vm440_vm2, %v574_v24 }
 0x19e   : > { %v625_v21 = vpop.f32.mrf.mxu1 }
 0x19f   : > { %441 = vst.msk [vmem:[%s213_s20] sm:$0xf] %vm440_vm2, %v572_v20  ;;  %v575_v25 = vpack.c.bf16 %v625_v21, %v625_v21 }
 0x1a0   : > { %v412_v22 = vpop.f32.mrf.mxu1 }
 0x1a1   : > { %v573_v23 = vpack.c.bf16 %v412_v22, %v412_v22  ;;  %444 = vst.msk [vmem:[%s213_s20 + $0xc] sm:$0xf] %vm440_vm2, %v575_v25 }
 0x1a3   : > { %442 = vst.msk [vmem:[%s213_s20 + $0x4] sm:$0xf] %vm440_vm2, %v573_v23 }
 0x1a4 PF: > { %s15_s15 = sadd.s32 1, %s651_s15  }
 0x1a5   : > { %p12_p4 = scmp.ge.s32.totalorder %s15_s15, 4  }
 0x1a7   :  { %14 = sbr.rel (!%p12_p4) target bundleno = 1 (0x1), region = 74 }

</bundles_post_ra>
